<compile_context>
chip_gen: v7x
topology: tpu7x:2x2x1
jax: 0.10.0
libtpu: 0.0.40
codegen_flags: <defaults>
</compile_context>

<pallas_src>
from functools import partial

import jax
import jax.numpy as jnp
from jax.experimental import pallas as pl
from jax.experimental.pallas import tpu as pltpu


# ----------------------------------------------------------------------------
# Fused kernel: conv1+bn1+relu+pool1 -> conv2+relu+pool2 -> conv3+relu+pool3*mask
#               -> fc_feature+relu -> experts + gate softmax + gated mixture
# ----------------------------------------------------------------------------
def _fused_kernel(x_ref, xflat_ref,
                  w1_ref, b1_ref, w2_ref, b2_ref, w3_ref, b3_ref,
                  wfc_ref, wff_ref, fcb_ref, hw_ref, hb_ref,
                  o_ref, *, num_experts, num_classes):
    Bb = x_ref.shape[0]

    def conv_relu_pool(hs, w_ref, b_ref):
        # hs: list of Bb per-sample (T, Cin) f32 activations (channels-last ->
        #     channels are the lane dim).  w_ref: (Cin, 3*Cout) bf16, taps packed
        #     [tap0 | tap1 | tap2] on the lane axis.
        T, Cin = hs[0].shape
        Cout = w_ref.shape[1] // 3
        zero = jnp.zeros((1, Cin), jnp.float32)
        # Zero-pad every sample in time and stack all samples along sublanes so
        # the whole layer is a single MXU matmul: (Bb*(T+2), Cin) @ (Cin, 3*Cout).
        xp = jnp.concatenate([blk for h in hs for blk in (zero, h, zero)], axis=0)
        y = jnp.dot(xp.astype(jnp.bfloat16), w_ref[...],
                    preferred_element_type=jnp.float32)            # (Bb*(T+2), 3*Cout)
        bias = b_ref[...]                                          # (1, Cout)
        outs = []
        for b in range(Bb):                                        # static unroll
            o = b * (T + 2)
            conv = (y[o:o + T, 0:Cout]
                    + y[o + 1:o + 1 + T, Cout:2 * Cout]
                    + y[o + 2:o + 2 + T, 2 * Cout:3 * Cout])       # (T, Cout)
            conv = jnp.maximum(conv + bias, 0.0)                   # bias + ReLU
            # MaxPool1d(kernel=2, stride=2) via static pairwise slices.
            pooled = jnp.concatenate(
                [jnp.maximum(conv[2 * p:2 * p + 1, :], conv[2 * p + 1:2 * p + 2, :])
                 for p in range(T // 2)],
                axis=0)                                            # (T//2, Cout)
            outs.append(pooled)
        return outs

    h = [x_ref[b] for b in range(Bb)]                              # Bb x (W, F)
    h = conv_relu_pool(h, w1_ref, b1_ref)                          # Bb x (W/2,  64)
    h = conv_relu_pool(h, w2_ref, b2_ref)                          # Bb x (W/4, 128)
    h = conv_relu_pool(h, w3_ref, b3_ref)                          # Bb x (W/8, 256)

    # fc_feature: relu(cnn_flat @ Wc + x_flat @ Wx + b).  Channel-major flatten,
    # pool3 linspace mask and torch.cat are all pre-folded into wfc / wff.
    P = h[0].shape[0]
    rows = []
    for b in range(Bb):
        acc = jnp.dot(xflat_ref[b].astype(jnp.bfloat16), wff_ref[...],
                      preferred_element_type=jnp.float32)          # (1, 128)
        h3 = h[b].astype(jnp.bfloat16)                             # (P, 256)
        for p in range(P):                                         # static unroll
            acc = acc + jnp.dot(h3[p:p + 1, :], wfc_ref[p],
                                preferred_element_type=jnp.float32)
        rows.append(acc)
    feats = jnp.maximum(jnp.concatenate(rows, axis=0) + fcb_ref[...], 0.0)  # (Bb, 128)

    # MoE head: one lane-dense matmul -> [all expert logits | gate logits].
    E, NC = num_experts, num_classes
    head = jnp.dot(feats.astype(jnp.bfloat16), hw_ref[...],
                   preferred_element_type=jnp.float32) + hb_ref[...]        # (Bb, E*NC+E)
    gl = head[:, E * NC:]                                          # gate logits (Bb, E)
    gl = gl - jnp.max(gl, axis=-1, keepdims=True)
    ge = jnp.exp(gl)
    gate = ge * pl.reciprocal(jnp.sum(ge, axis=-1, keepdims=True), approx=True)

    out = jnp.zeros((Bb, NC), jnp.float32)
    for e in range(E):                                             # == bmm(experts, gate^T)
        out = out + head[:, e * NC:(e + 1) * NC] * gate[:, e:e + 1]
    o_ref[...] = out.astype(o_ref.dtype)


# ----------------------------------------------------------------------------
# Wrapper
# ----------------------------------------------------------------------------
def hybrid_moe_forward(x, params, *, num_classes, num_experts):
    B, W, F = x.shape
    # Batch block: largest divisor of B up to 8 samples per grid step.
    bm = 1
    for d in (8, 4, 2, 1):
        if B % d == 0:
            bm = d
            break
    grid = (B // bm,)
    xflat = x.reshape(B, 1, W * F)                                 # torch .view(B, -1)

    weight_keys = ("w1", "b1", "w2", "b2", "w3", "b3",
                   "wfc", "wff", "fcb", "hw", "hb")
    weights = [params[k] for k in weight_keys]

    def whole(a):
        nd = a.ndim
        return pl.BlockSpec(a.shape, lambda i, _nd=nd: (0,) * _nd)  # VMEM-resident weight

    out = pl.pallas_call(
        partial(_fused_kernel, num_experts=num_experts, num_classes=num_classes),
        out_shape=jax.ShapeDtypeStruct((B, num_classes), jnp.float32),
        grid=grid,
        in_specs=[pl.BlockSpec((bm, W, F), lambda i: (i, 0, 0)),
                  pl.BlockSpec((bm, 1, W * F), lambda i: (i, 0, 0))]
                 + [whole(w) for w in weights],
        out_specs=pl.BlockSpec((bm, num_classes), lambda i: (i, 0)),
        compiler_params=pltpu.CompilerParams(
            dimension_semantics=("parallel",)),
    )(x, xflat, *weights)
    return out


# ----------------------------------------------------------------------------
# Parameter construction (torch layouts, then packed/folded for the kernel)
# ----------------------------------------------------------------------------
def init_params(key, window_size, input_features, num_classes, num_experts):
    ks = jax.random.split(key, 10)
    P = window_size // 8
    cnn_dim = 256 * P
    flat_dim = window_size * input_features
    combined = cnn_dim + flat_dim

    def nrm(k, shape, scale=0.1):
        return scale * jax.random.normal(k, shape, jnp.float32)

    def pack_conv(w_t, b, fold=1.0):
        # w_t: torch Conv1d layout (Cout, Cin, k=3) -> packed (Cin, 3*Cout),
        # column d*Cout + o = w_t[o, :, d]  (tap-major blocks).
        Cout, Cin, K = w_t.shape
        wp = jnp.transpose(w_t, (1, 2, 0)).reshape(Cin, K * Cout) * fold
        return wp.astype(jnp.bfloat16), (b * fold).reshape(1, Cout).astype(jnp.float32)

    # Fold eval-mode BatchNorm1d (mean=0, var=1, gamma=1, beta=0, eps=1e-5) into conv1.
    bn_scale = 1.0 / jnp.sqrt(1.0 + 1e-5)
    w1, b1 = pack_conv(nrm(ks[0], (64, input_features, 3)), nrm(ks[1], (64,)), bn_scale)
    w2, b2 = pack_conv(nrm(ks[2], (128, 64, 3)), nrm(ks[3], (128,)))
    w3, b3 = pack_conv(nrm(ks[4], (256, 128, 3)), nrm(ks[5], (256,)))

    # fc_feature weight (combined_dim, 128): rows [0, cnn_dim) follow torch's
    # channel-major flatten index c*P + p.  Fold the transpose and the
    # torch.linspace(1.0, 1.2, P) mask into the weight.
    wf_full = nrm(ks[6], (combined, 128), scale=0.02)
    mask = jnp.linspace(1.0, 1.2, P).astype(jnp.float32)
    wfc = (jnp.transpose(wf_full[:cnn_dim].reshape(256, P, 128), (1, 0, 2))
           * mask[:, None, None]).astype(jnp.bfloat16)             # (P, 256, 128)
    wff = wf_full[cnn_dim:].astype(jnp.bfloat16)                   # (flat_dim, 128)
    fcb = nrm(ks[7], (128,)).reshape(1, 128)

    # Experts + gate packed into one lane-dense weight (128, E*NC + E).
    ew = nrm(ks[8], (num_experts, 128, num_classes))               # (E, in, out)
    eb = jnp.zeros((num_experts, num_classes), jnp.float32)
    gw = nrm(ks[9], (128, num_experts))
    gb = jnp.zeros((num_experts,), jnp.float32)
    ew_packed = jnp.transpose(ew, (1, 0, 2)).reshape(128, num_experts * num_classes)
    hw = jnp.concatenate([ew_packed, gw], axis=1).astype(jnp.bfloat16)
    hb = jnp.concatenate([eb.reshape(-1), gb]).reshape(1, -1).astype(jnp.float32)

    return dict(w1=w1, b1=b1, w2=w2, b2=b2, w3=w3, b3=b3,
                wfc=wfc, wff=wff, fcb=fcb, hw=hw, hb=hb)


if __name__ == "__main__":
    B, W, F = 2, 16, 6          # batch, window_size, input_features
    NUM_CLASSES, NUM_EXPERTS = 5, 3

    key = jax.random.PRNGKey(0)
    kx, kp = jax.random.split(key)
    x = jax.random.normal(kx, (B, W, F), jnp.float32)
    params = init_params(kp, W, F, NUM_CLASSES, NUM_EXPERTS)

    out = hybrid_moe_forward(x, params, num_classes=NUM_CLASSES, num_experts=NUM_EXPERTS)
    out = jax.block_until_ready(out)

    assert out.shape == (B, NUM_CLASSES), out.shape
    assert bool(jnp.all(jnp.isfinite(out)))
    print("KERNEL_OK")
</pallas_src>

<mosaic_0001>
module attributes {stable_mosaic.version = 11 : i64} {
  func.func @_fused_kernel(%arg0: i32, %arg1: memref<2x16x6xf32, #tpu.memory_space<vmem>>, %arg2: memref<2x1x96xf32, #tpu.memory_space<vmem>>, %arg3: memref<6x192xbf16, #tpu.memory_space<vmem>>, %arg4: memref<1x64xf32, #tpu.memory_space<vmem>>, %arg5: memref<64x384xbf16, #tpu.memory_space<vmem>>, %arg6: memref<1x128xf32, #tpu.memory_space<vmem>>, %arg7: memref<128x768xbf16, #tpu.memory_space<vmem>>, %arg8: memref<1x256xf32, #tpu.memory_space<vmem>>, %arg9: memref<2x256x128xbf16, #tpu.memory_space<vmem>>, %arg10: memref<96x128xbf16, #tpu.memory_space<vmem>>, %arg11: memref<1x128xf32, #tpu.memory_space<vmem>>, %arg12: memref<128x18xbf16, #tpu.memory_space<vmem>>, %arg13: memref<1x18xf32, #tpu.memory_space<vmem>>, %arg14: memref<2x5xf32, #tpu.memory_space<vmem>>) attributes {dimension_semantics = [#tpu.dimension_semantics<parallel>], iteration_bounds = array<i64: 1>, scalar_prefetch = 0 : i64, scratch_operands = 0 : i64, tpu.core_type = #tpu.core_type<tc>, window_params = [{transform_indices = @transform_0, window_bounds = array<i64: 2, 16, 6>}, {transform_indices = @transform_1, window_bounds = array<i64: 2, 1, 96>}, {pipeline_mode = #tpu.pipeline_mode<synchronous>, transform_indices = @transform_2, window_bounds = array<i64: 6, 192>}, {pipeline_mode = #tpu.pipeline_mode<synchronous>, transform_indices = @transform_3, window_bounds = array<i64: 1, 64>}, {pipeline_mode = #tpu.pipeline_mode<synchronous>, transform_indices = @transform_4, window_bounds = array<i64: 64, 384>}, {pipeline_mode = #tpu.pipeline_mode<synchronous>, transform_indices = @transform_5, window_bounds = array<i64: 1, 128>}, {pipeline_mode = #tpu.pipeline_mode<synchronous>, transform_indices = @transform_6, window_bounds = array<i64: 128, 768>}, {pipeline_mode = #tpu.pipeline_mode<synchronous>, transform_indices = @transform_7, window_bounds = array<i64: 1, 256>}, {pipeline_mode = #tpu.pipeline_mode<synchronous>, transform_indices = @transform_8, window_bounds = array<i64: 2, 256, 128>}, {pipeline_mode = #tpu.pipeline_mode<synchronous>, transform_indices = @transform_9, window_bounds = array<i64: 96, 128>}, {pipeline_mode = #tpu.pipeline_mode<synchronous>, transform_indices = @transform_10, window_bounds = array<i64: 1, 128>}, {pipeline_mode = #tpu.pipeline_mode<synchronous>, transform_indices = @transform_11, window_bounds = array<i64: 128, 18>}, {pipeline_mode = #tpu.pipeline_mode<synchronous>, transform_indices = @transform_12, window_bounds = array<i64: 1, 18>}, {transform_indices = @transform_13, window_bounds = array<i64: 2, 5>}]} {
    %c0 = arith.constant 0 : index
    %c0_0 = arith.constant 0 : index
    %c0_1 = arith.constant 0 : index
    %0 = vector.load %arg1[%c0, %c0_0, %c0_1] : memref<2x16x6xf32, #tpu.memory_space<vmem>>, vector<1x16x6xf32>
    %1 = vector.shape_cast %0 : vector<1x16x6xf32> to vector<16x6xf32>
    %c1 = arith.constant 1 : index
    %c0_2 = arith.constant 0 : index
    %c0_3 = arith.constant 0 : index
    %2 = vector.load %arg1[%c1, %c0_2, %c0_3] : memref<2x16x6xf32, #tpu.memory_space<vmem>>, vector<1x16x6xf32>
    %3 = vector.shape_cast %2 : vector<1x16x6xf32> to vector<16x6xf32>
    %cst = arith.constant 0.000000e+00 : f32
    %4 = vector.broadcast %cst : f32 to vector<1x6xf32>
    %5 = tpu.concatenate %4, %1, %4, %4, %3, %4 in 0 : vector<1x6xf32>, vector<16x6xf32>, vector<1x6xf32>, vector<1x6xf32>, vector<16x6xf32>, vector<1x6xf32> -> vector<36x6xf32>
    %6 = arith.truncf %5 : vector<36x6xf32> to vector<36x6xbf16>
    %c0_4 = arith.constant 0 : index
    %c0_5 = arith.constant 0 : index
    %7 = vector.load %arg3[%c0_4, %c0_5] : memref<6x192xbf16, #tpu.memory_space<vmem>>, vector<6x192xbf16>
    %cst_6 = arith.constant dense<0.000000e+00> : vector<36x192xf32>
    %8 = tpu.matmul %6, %7, %cst_6 {dimension_numbers = #tpu.dot_dimension_numbers<[1], [0], [0], [1], [0, 0, 1, 1], [], []>} : vector<36x6xbf16>, vector<6x192xbf16>, vector<36x192xf32> -> vector<36x192xf32>
    %c0_7 = arith.constant 0 : index
    %c0_8 = arith.constant 0 : index
    %9 = vector.load %arg4[%c0_7, %c0_8] : memref<1x64xf32, #tpu.memory_space<vmem>>, vector<1x64xf32>
    %10 = vector.extract_strided_slice %8 {offsets = [0, 0], sizes = [16, 64], strides = [1, 1]} : vector<36x192xf32> to vector<16x64xf32>
    %11 = vector.extract_strided_slice %8 {offsets = [1, 64], sizes = [16, 64], strides = [1, 1]} : vector<36x192xf32> to vector<16x64xf32>
    %12 = arith.addf %10, %11 : vector<16x64xf32>
    %13 = vector.extract_strided_slice %8 {offsets = [2, 128], sizes = [16, 64], strides = [1, 1]} : vector<36x192xf32> to vector<16x64xf32>
    %14 = arith.addf %12, %13 : vector<16x64xf32>
    %15 = vector.broadcast %9 : vector<1x64xf32> to vector<16x64xf32>
    %16 = arith.addf %14, %15 : vector<16x64xf32>
    %cst_9 = arith.constant 0.000000e+00 : f32
    %17 = vector.broadcast %cst_9 : f32 to vector<16x64xf32>
    %18 = arith.maximumf %16, %17 : vector<16x64xf32>
    %19 = vector.extract_strided_slice %18 {offsets = [0, 0], sizes = [1, 64], strides = [1, 1]} : vector<16x64xf32> to vector<1x64xf32>
    %20 = vector.extract_strided_slice %18 {offsets = [1, 0], sizes = [1, 64], strides = [1, 1]} : vector<16x64xf32> to vector<1x64xf32>
    %21 = arith.maximumf %19, %20 : vector<1x64xf32>
    %22 = vector.extract_strided_slice %18 {offsets = [2, 0], sizes = [1, 64], strides = [1, 1]} : vector<16x64xf32> to vector<1x64xf32>
    %23 = vector.extract_strided_slice %18 {offsets = [3, 0], sizes = [1, 64], strides = [1, 1]} : vector<16x64xf32> to vector<1x64xf32>
    %24 = arith.maximumf %22, %23 : vector<1x64xf32>
    %25 = vector.extract_strided_slice %18 {offsets = [4, 0], sizes = [1, 64], strides = [1, 1]} : vector<16x64xf32> to vector<1x64xf32>
    %26 = vector.extract_strided_slice %18 {offsets = [5, 0], sizes = [1, 64], strides = [1, 1]} : vector<16x64xf32> to vector<1x64xf32>
    %27 = arith.maximumf %25, %26 : vector<1x64xf32>
    %28 = vector.extract_strided_slice %18 {offsets = [6, 0], sizes = [1, 64], strides = [1, 1]} : vector<16x64xf32> to vector<1x64xf32>
    %29 = vector.extract_strided_slice %18 {offsets = [7, 0], sizes = [1, 64], strides = [1, 1]} : vector<16x64xf32> to vector<1x64xf32>
    %30 = arith.maximumf %28, %29 : vector<1x64xf32>
    %31 = vector.extract_strided_slice %18 {offsets = [8, 0], sizes = [1, 64], strides = [1, 1]} : vector<16x64xf32> to vector<1x64xf32>
    %32 = vector.extract_strided_slice %18 {offsets = [9, 0], sizes = [1, 64], strides = [1, 1]} : vector<16x64xf32> to vector<1x64xf32>
    %33 = arith.maximumf %31, %32 : vector<1x64xf32>
    %34 = vector.extract_strided_slice %18 {offsets = [10, 0], sizes = [1, 64], strides = [1, 1]} : vector<16x64xf32> to vector<1x64xf32>
    %35 = vector.extract_strided_slice %18 {offsets = [11, 0], sizes = [1, 64], strides = [1, 1]} : vector<16x64xf32> to vector<1x64xf32>
    %36 = arith.maximumf %34, %35 : vector<1x64xf32>
    %37 = vector.extract_strided_slice %18 {offsets = [12, 0], sizes = [1, 64], strides = [1, 1]} : vector<16x64xf32> to vector<1x64xf32>
    %38 = vector.extract_strided_slice %18 {offsets = [13, 0], sizes = [1, 64], strides = [1, 1]} : vector<16x64xf32> to vector<1x64xf32>
    %39 = arith.maximumf %37, %38 : vector<1x64xf32>
    %40 = vector.extract_strided_slice %18 {offsets = [14, 0], sizes = [1, 64], strides = [1, 1]} : vector<16x64xf32> to vector<1x64xf32>
    %41 = vector.extract_strided_slice %18 {offsets = [15, 0], sizes = [1, 64], strides = [1, 1]} : vector<16x64xf32> to vector<1x64xf32>
    %42 = arith.maximumf %40, %41 : vector<1x64xf32>
    %43 = tpu.concatenate %21, %24, %27, %30, %33, %36, %39, %42 in 0 : vector<1x64xf32>, vector<1x64xf32>, vector<1x64xf32>, vector<1x64xf32>, vector<1x64xf32>, vector<1x64xf32>, vector<1x64xf32>, vector<1x64xf32> -> vector<8x64xf32>
    %44 = vector.extract_strided_slice %8 {offsets = [18, 0], sizes = [16, 64], strides = [1, 1]} : vector<36x192xf32> to vector<16x64xf32>
    %45 = vector.extract_strided_slice %8 {offsets = [19, 64], sizes = [16, 64], strides = [1, 1]} : vector<36x192xf32> to vector<16x64xf32>
    %46 = arith.addf %44, %45 : vector<16x64xf32>
    %47 = vector.extract_strided_slice %8 {offsets = [20, 128], sizes = [16, 64], strides = [1, 1]} : vector<36x192xf32> to vector<16x64xf32>
    %48 = arith.addf %46, %47 : vector<16x64xf32>
    %49 = vector.broadcast %9 : vector<1x64xf32> to vector<16x64xf32>
    %50 = arith.addf %48, %49 : vector<16x64xf32>
    %cst_10 = arith.constant 0.000000e+00 : f32
    %51 = vector.broadcast %cst_10 : f32 to vector<16x64xf32>
    %52 = arith.maximumf %50, %51 : vector<16x64xf32>
    %53 = vector.extract_strided_slice %52 {offsets = [0, 0], sizes = [1, 64], strides = [1, 1]} : vector<16x64xf32> to vector<1x64xf32>
    %54 = vector.extract_strided_slice %52 {offsets = [1, 0], sizes = [1, 64], strides = [1, 1]} : vector<16x64xf32> to vector<1x64xf32>
    %55 = arith.maximumf %53, %54 : vector<1x64xf32>
    %56 = vector.extract_strided_slice %52 {offsets = [2, 0], sizes = [1, 64], strides = [1, 1]} : vector<16x64xf32> to vector<1x64xf32>
    %57 = vector.extract_strided_slice %52 {offsets = [3, 0], sizes = [1, 64], strides = [1, 1]} : vector<16x64xf32> to vector<1x64xf32>
    %58 = arith.maximumf %56, %57 : vector<1x64xf32>
    %59 = vector.extract_strided_slice %52 {offsets = [4, 0], sizes = [1, 64], strides = [1, 1]} : vector<16x64xf32> to vector<1x64xf32>
    %60 = vector.extract_strided_slice %52 {offsets = [5, 0], sizes = [1, 64], strides = [1, 1]} : vector<16x64xf32> to vector<1x64xf32>
    %61 = arith.maximumf %59, %60 : vector<1x64xf32>
    %62 = vector.extract_strided_slice %52 {offsets = [6, 0], sizes = [1, 64], strides = [1, 1]} : vector<16x64xf32> to vector<1x64xf32>
    %63 = vector.extract_strided_slice %52 {offsets = [7, 0], sizes = [1, 64], strides = [1, 1]} : vector<16x64xf32> to vector<1x64xf32>
    %64 = arith.maximumf %62, %63 : vector<1x64xf32>
    %65 = vector.extract_strided_slice %52 {offsets = [8, 0], sizes = [1, 64], strides = [1, 1]} : vector<16x64xf32> to vector<1x64xf32>
    %66 = vector.extract_strided_slice %52 {offsets = [9, 0], sizes = [1, 64], strides = [1, 1]} : vector<16x64xf32> to vector<1x64xf32>
    %67 = arith.maximumf %65, %66 : vector<1x64xf32>
    %68 = vector.extract_strided_slice %52 {offsets = [10, 0], sizes = [1, 64], strides = [1, 1]} : vector<16x64xf32> to vector<1x64xf32>
    %69 = vector.extract_strided_slice %52 {offsets = [11, 0], sizes = [1, 64], strides = [1, 1]} : vector<16x64xf32> to vector<1x64xf32>
    %70 = arith.maximumf %68, %69 : vector<1x64xf32>
    %71 = vector.extract_strided_slice %52 {offsets = [12, 0], sizes = [1, 64], strides = [1, 1]} : vector<16x64xf32> to vector<1x64xf32>
    %72 = vector.extract_strided_slice %52 {offsets = [13, 0], sizes = [1, 64], strides = [1, 1]} : vector<16x64xf32> to vector<1x64xf32>
    %73 = arith.maximumf %71, %72 : vector<1x64xf32>
    %74 = vector.extract_strided_slice %52 {offsets = [14, 0], sizes = [1, 64], strides = [1, 1]} : vector<16x64xf32> to vector<1x64xf32>
    %75 = vector.extract_strided_slice %52 {offsets = [15, 0], sizes = [1, 64], strides = [1, 1]} : vector<16x64xf32> to vector<1x64xf32>
    %76 = arith.maximumf %74, %75 : vector<1x64xf32>
    %77 = tpu.concatenate %55, %58, %61, %64, %67, %70, %73, %76 in 0 : vector<1x64xf32>, vector<1x64xf32>, vector<1x64xf32>, vector<1x64xf32>, vector<1x64xf32>, vector<1x64xf32>, vector<1x64xf32>, vector<1x64xf32> -> vector<8x64xf32>
    %cst_11 = arith.constant 0.000000e+00 : f32
    %78 = vector.broadcast %cst_11 : f32 to vector<1x64xf32>
    %79 = tpu.concatenate %78, %43, %78, %78, %77, %78 in 0 : vector<1x64xf32>, vector<8x64xf32>, vector<1x64xf32>, vector<1x64xf32>, vector<8x64xf32>, vector<1x64xf32> -> vector<20x64xf32>
    %80 = arith.truncf %79 : vector<20x64xf32> to vector<20x64xbf16>
    %c0_12 = arith.constant 0 : index
    %c0_13 = arith.constant 0 : index
    %81 = vector.load %arg5[%c0_12, %c0_13] : memref<64x384xbf16, #tpu.memory_space<vmem>>, vector<64x384xbf16>
    %cst_14 = arith.constant dense<0.000000e+00> : vector<20x384xf32>
    %82 = tpu.matmul %80, %81, %cst_14 {dimension_numbers = #tpu.dot_dimension_numbers<[1], [0], [0], [1], [0, 0, 1, 1], [], []>} : vector<20x64xbf16>, vector<64x384xbf16>, vector<20x384xf32> -> vector<20x384xf32>
    %c0_15 = arith.constant 0 : index
    %c0_16 = arith.constant 0 : index
    %83 = vector.load %arg6[%c0_15, %c0_16] : memref<1x128xf32, #tpu.memory_space<vmem>>, vector<1x128xf32>
    %84 = vector.extract_strided_slice %82 {offsets = [0, 0], sizes = [8, 128], strides = [1, 1]} : vector<20x384xf32> to vector<8x128xf32>
    %85 = vector.extract_strided_slice %82 {offsets = [1, 128], sizes = [8, 128], strides = [1, 1]} : vector<20x384xf32> to vector<8x128xf32>
    %86 = arith.addf %84, %85 : vector<8x128xf32>
    %87 = vector.extract_strided_slice %82 {offsets = [2, 256], sizes = [8, 128], strides = [1, 1]} : vector<20x384xf32> to vector<8x128xf32>
    %88 = arith.addf %86, %87 : vector<8x128xf32>
    %89 = vector.broadcast %83 : vector<1x128xf32> to vector<8x128xf32>
    %90 = arith.addf %88, %89 : vector<8x128xf32>
    %cst_17 = arith.constant 0.000000e+00 : f32
    %91 = vector.broadcast %cst_17 : f32 to vector<8x128xf32>
    %92 = arith.maximumf %90, %91 : vector<8x128xf32>
    %93 = vector.extract_strided_slice %92 {offsets = [0, 0], sizes = [1, 128], strides = [1, 1]} : vector<8x128xf32> to vector<1x128xf32>
    %94 = vector.extract_strided_slice %92 {offsets = [1, 0], sizes = [1, 128], strides = [1, 1]} : vector<8x128xf32> to vector<1x128xf32>
    %95 = arith.maximumf %93, %94 : vector<1x128xf32>
    %96 = vector.extract_strided_slice %92 {offsets = [2, 0], sizes = [1, 128], strides = [1, 1]} : vector<8x128xf32> to vector<1x128xf32>
    %97 = vector.extract_strided_slice %92 {offsets = [3, 0], sizes = [1, 128], strides = [1, 1]} : vector<8x128xf32> to vector<1x128xf32>
    %98 = arith.maximumf %96, %97 : vector<1x128xf32>
    %99 = vector.extract_strided_slice %92 {offsets = [4, 0], sizes = [1, 128], strides = [1, 1]} : vector<8x128xf32> to vector<1x128xf32>
    %100 = vector.extract_strided_slice %92 {offsets = [5, 0], sizes = [1, 128], strides = [1, 1]} : vector<8x128xf32> to vector<1x128xf32>
    %101 = arith.maximumf %99, %100 : vector<1x128xf32>
    %102 = vector.extract_strided_slice %92 {offsets = [6, 0], sizes = [1, 128], strides = [1, 1]} : vector<8x128xf32> to vector<1x128xf32>
    %103 = vector.extract_strided_slice %92 {offsets = [7, 0], sizes = [1, 128], strides = [1, 1]} : vector<8x128xf32> to vector<1x128xf32>
    %104 = arith.maximumf %102, %103 : vector<1x128xf32>
    %105 = tpu.concatenate %95, %98, %101, %104 in 0 : vector<1x128xf32>, vector<1x128xf32>, vector<1x128xf32>, vector<1x128xf32> -> vector<4x128xf32>
    %106 = vector.extract_strided_slice %82 {offsets = [10, 0], sizes = [8, 128], strides = [1, 1]} : vector<20x384xf32> to vector<8x128xf32>
    %107 = vector.extract_strided_slice %82 {offsets = [11, 128], sizes = [8, 128], strides = [1, 1]} : vector<20x384xf32> to vector<8x128xf32>
    %108 = arith.addf %106, %107 : vector<8x128xf32>
    %109 = vector.extract_strided_slice %82 {offsets = [12, 256], sizes = [8, 128], strides = [1, 1]} : vector<20x384xf32> to vector<8x128xf32>
    %110 = arith.addf %108, %109 : vector<8x128xf32>
    %111 = vector.broadcast %83 : vector<1x128xf32> to vector<8x128xf32>
    %112 = arith.addf %110, %111 : vector<8x128xf32>
    %cst_18 = arith.constant 0.000000e+00 : f32
    %113 = vector.broadcast %cst_18 : f32 to vector<8x128xf32>
    %114 = arith.maximumf %112, %113 : vector<8x128xf32>
    %115 = vector.extract_strided_slice %114 {offsets = [0, 0], sizes = [1, 128], strides = [1, 1]} : vector<8x128xf32> to vector<1x128xf32>
    %116 = vector.extract_strided_slice %114 {offsets = [1, 0], sizes = [1, 128], strides = [1, 1]} : vector<8x128xf32> to vector<1x128xf32>
    %117 = arith.maximumf %115, %116 : vector<1x128xf32>
    %118 = vector.extract_strided_slice %114 {offsets = [2, 0], sizes = [1, 128], strides = [1, 1]} : vector<8x128xf32> to vector<1x128xf32>
    %119 = vector.extract_strided_slice %114 {offsets = [3, 0], sizes = [1, 128], strides = [1, 1]} : vector<8x128xf32> to vector<1x128xf32>
    %120 = arith.maximumf %118, %119 : vector<1x128xf32>
    %121 = vector.extract_strided_slice %114 {offsets = [4, 0], sizes = [1, 128], strides = [1, 1]} : vector<8x128xf32> to vector<1x128xf32>
    %122 = vector.extract_strided_slice %114 {offsets = [5, 0], sizes = [1, 128], strides = [1, 1]} : vector<8x128xf32> to vector<1x128xf32>
    %123 = arith.maximumf %121, %122 : vector<1x128xf32>
    %124 = vector.extract_strided_slice %114 {offsets = [6, 0], sizes = [1, 128], strides = [1, 1]} : vector<8x128xf32> to vector<1x128xf32>
    %125 = vector.extract_strided_slice %114 {offsets = [7, 0], sizes = [1, 128], strides = [1, 1]} : vector<8x128xf32> to vector<1x128xf32>
    %126 = arith.maximumf %124, %125 : vector<1x128xf32>
    %127 = tpu.concatenate %117, %120, %123, %126 in 0 : vector<1x128xf32>, vector<1x128xf32>, vector<1x128xf32>, vector<1x128xf32> -> vector<4x128xf32>
    %cst_19 = arith.constant 0.000000e+00 : f32
    %128 = vector.broadcast %cst_19 : f32 to vector<1x128xf32>
    %129 = tpu.concatenate %128, %105, %128, %128, %127, %128 in 0 : vector<1x128xf32>, vector<4x128xf32>, vector<1x128xf32>, vector<1x128xf32>, vector<4x128xf32>, vector<1x128xf32> -> vector<12x128xf32>
    %130 = arith.truncf %129 : vector<12x128xf32> to vector<12x128xbf16>
    %c0_20 = arith.constant 0 : index
    %c0_21 = arith.constant 0 : index
    %131 = vector.load %arg7[%c0_20, %c0_21] : memref<128x768xbf16, #tpu.memory_space<vmem>>, vector<128x768xbf16>
    %cst_22 = arith.constant dense<0.000000e+00> : vector<12x768xf32>
    %132 = tpu.matmul %130, %131, %cst_22 {dimension_numbers = #tpu.dot_dimension_numbers<[1], [0], [0], [1], [0, 0, 1, 1], [], []>} : vector<12x128xbf16>, vector<128x768xbf16>, vector<12x768xf32> -> vector<12x768xf32>
    %c0_23 = arith.constant 0 : index
    %c0_24 = arith.constant 0 : index
    %133 = vector.load %arg8[%c0_23, %c0_24] : memref<1x256xf32, #tpu.memory_space<vmem>>, vector<1x256xf32>
    %134 = vector.extract_strided_slice %132 {offsets = [0, 0], sizes = [4, 256], strides = [1, 1]} : vector<12x768xf32> to vector<4x256xf32>
    %135 = vector.extract_strided_slice %132 {offsets = [1, 256], sizes = [4, 256], strides = [1, 1]} : vector<12x768xf32> to vector<4x256xf32>
    %136 = arith.addf %134, %135 : vector<4x256xf32>
    %137 = vector.extract_strided_slice %132 {offsets = [2, 512], sizes = [4, 256], strides = [1, 1]} : vector<12x768xf32> to vector<4x256xf32>
    %138 = arith.addf %136, %137 : vector<4x256xf32>
    %139 = vector.broadcast %133 : vector<1x256xf32> to vector<4x256xf32>
    %140 = arith.addf %138, %139 : vector<4x256xf32>
    %cst_25 = arith.constant 0.000000e+00 : f32
    %141 = vector.broadcast %cst_25 : f32 to vector<4x256xf32>
    %142 = arith.maximumf %140, %141 : vector<4x256xf32>
    %143 = vector.extract_strided_slice %142 {offsets = [0, 0], sizes = [1, 256], strides = [1, 1]} : vector<4x256xf32> to vector<1x256xf32>
    %144 = vector.extract_strided_slice %142 {offsets = [1, 0], sizes = [1, 256], strides = [1, 1]} : vector<4x256xf32> to vector<1x256xf32>
    %145 = arith.maximumf %143, %144 : vector<1x256xf32>
    %146 = vector.extract_strided_slice %142 {offsets = [2, 0], sizes = [1, 256], strides = [1, 1]} : vector<4x256xf32> to vector<1x256xf32>
    %147 = vector.extract_strided_slice %142 {offsets = [3, 0], sizes = [1, 256], strides = [1, 1]} : vector<4x256xf32> to vector<1x256xf32>
    %148 = arith.maximumf %146, %147 : vector<1x256xf32>
    %149 = tpu.concatenate %145, %148 in 0 : vector<1x256xf32>, vector<1x256xf32> -> vector<2x256xf32>
    %150 = vector.extract_strided_slice %132 {offsets = [6, 0], sizes = [4, 256], strides = [1, 1]} : vector<12x768xf32> to vector<4x256xf32>
    %151 = vector.extract_strided_slice %132 {offsets = [7, 256], sizes = [4, 256], strides = [1, 1]} : vector<12x768xf32> to vector<4x256xf32>
    %152 = arith.addf %150, %151 : vector<4x256xf32>
    %153 = vector.extract_strided_slice %132 {offsets = [8, 512], sizes = [4, 256], strides = [1, 1]} : vector<12x768xf32> to vector<4x256xf32>
    %154 = arith.addf %152, %153 : vector<4x256xf32>
    %155 = vector.broadcast %133 : vector<1x256xf32> to vector<4x256xf32>
    %156 = arith.addf %154, %155 : vector<4x256xf32>
    %cst_26 = arith.constant 0.000000e+00 : f32
    %157 = vector.broadcast %cst_26 : f32 to vector<4x256xf32>
    %158 = arith.maximumf %156, %157 : vector<4x256xf32>
    %159 = vector.extract_strided_slice %158 {offsets = [0, 0], sizes = [1, 256], strides = [1, 1]} : vector<4x256xf32> to vector<1x256xf32>
    %160 = vector.extract_strided_slice %158 {offsets = [1, 0], sizes = [1, 256], strides = [1, 1]} : vector<4x256xf32> to vector<1x256xf32>
    %161 = arith.maximumf %159, %160 : vector<1x256xf32>
    %162 = vector.extract_strided_slice %158 {offsets = [2, 0], sizes = [1, 256], strides = [1, 1]} : vector<4x256xf32> to vector<1x256xf32>
    %163 = vector.extract_strided_slice %158 {offsets = [3, 0], sizes = [1, 256], strides = [1, 1]} : vector<4x256xf32> to vector<1x256xf32>
    %164 = arith.maximumf %162, %163 : vector<1x256xf32>
    %165 = tpu.concatenate %161, %164 in 0 : vector<1x256xf32>, vector<1x256xf32> -> vector<2x256xf32>
    %c0_27 = arith.constant 0 : index
    %c0_28 = arith.constant 0 : index
    %c0_29 = arith.constant 0 : index
    %166 = vector.load %arg2[%c0_27, %c0_28, %c0_29] : memref<2x1x96xf32, #tpu.memory_space<vmem>>, vector<1x1x96xf32>
    %167 = vector.shape_cast %166 : vector<1x1x96xf32> to vector<1x96xf32>
    %168 = arith.truncf %167 : vector<1x96xf32> to vector<1x96xbf16>
    %c0_30 = arith.constant 0 : index
    %c0_31 = arith.constant 0 : index
    %169 = vector.load %arg10[%c0_30, %c0_31] : memref<96x128xbf16, #tpu.memory_space<vmem>>, vector<96x128xbf16>
    %cst_32 = arith.constant dense<0.000000e+00> : vector<1x128xf32>
    %170 = tpu.matmul %168, %169, %cst_32 {dimension_numbers = #tpu.dot_dimension_numbers<[1], [0], [0], [1], [0, 0, 1, 1], [], []>} : vector<1x96xbf16>, vector<96x128xbf16>, vector<1x128xf32> -> vector<1x128xf32>
    %171 = arith.truncf %149 : vector<2x256xf32> to vector<2x256xbf16>
    %172 = vector.extract_strided_slice %171 {offsets = [0, 0], sizes = [1, 256], strides = [1, 1]} : vector<2x256xbf16> to vector<1x256xbf16>
    %c0_33 = arith.constant 0 : index
    %c0_34 = arith.constant 0 : index
    %c0_35 = arith.constant 0 : index
    %173 = vector.load %arg9[%c0_33, %c0_34, %c0_35] : memref<2x256x128xbf16, #tpu.memory_space<vmem>>, vector<1x256x128xbf16>
    %174 = vector.shape_cast %173 : vector<1x256x128xbf16> to vector<256x128xbf16>
    %cst_36 = arith.constant dense<0.000000e+00> : vector<1x128xf32>
    %175 = tpu.matmul %172, %174, %cst_36 {dimension_numbers = #tpu.dot_dimension_numbers<[1], [0], [0], [1], [0, 0, 1, 1], [], []>} : vector<1x256xbf16>, vector<256x128xbf16>, vector<1x128xf32> -> vector<1x128xf32>
    %176 = arith.addf %170, %175 : vector<1x128xf32>
    %177 = vector.extract_strided_slice %171 {offsets = [1, 0], sizes = [1, 256], strides = [1, 1]} : vector<2x256xbf16> to vector<1x256xbf16>
    %c1_37 = arith.constant 1 : index
    %c0_38 = arith.constant 0 : index
    %c0_39 = arith.constant 0 : index
    %178 = vector.load %arg9[%c1_37, %c0_38, %c0_39] : memref<2x256x128xbf16, #tpu.memory_space<vmem>>, vector<1x256x128xbf16>
    %179 = vector.shape_cast %178 : vector<1x256x128xbf16> to vector<256x128xbf16>
    %cst_40 = arith.constant dense<0.000000e+00> : vector<1x128xf32>
    %180 = tpu.matmul %177, %179, %cst_40 {dimension_numbers = #tpu.dot_dimension_numbers<[1], [0], [0], [1], [0, 0, 1, 1], [], []>} : vector<1x256xbf16>, vector<256x128xbf16>, vector<1x128xf32> -> vector<1x128xf32>
    %181 = arith.addf %176, %180 : vector<1x128xf32>
    %c1_41 = arith.constant 1 : index
    %c0_42 = arith.constant 0 : index
    %c0_43 = arith.constant 0 : index
    %182 = vector.load %arg2[%c1_41, %c0_42, %c0_43] : memref<2x1x96xf32, #tpu.memory_space<vmem>>, vector<1x1x96xf32>
    %183 = vector.shape_cast %182 : vector<1x1x96xf32> to vector<1x96xf32>
    %184 = arith.truncf %183 : vector<1x96xf32> to vector<1x96xbf16>
    %c0_44 = arith.constant 0 : index
    %c0_45 = arith.constant 0 : index
    %185 = vector.load %arg10[%c0_44, %c0_45] : memref<96x128xbf16, #tpu.memory_space<vmem>>, vector<96x128xbf16>
    %cst_46 = arith.constant dense<0.000000e+00> : vector<1x128xf32>
    %186 = tpu.matmul %184, %185, %cst_46 {dimension_numbers = #tpu.dot_dimension_numbers<[1], [0], [0], [1], [0, 0, 1, 1], [], []>} : vector<1x96xbf16>, vector<96x128xbf16>, vector<1x128xf32> -> vector<1x128xf32>
    %187 = arith.truncf %165 : vector<2x256xf32> to vector<2x256xbf16>
    %188 = vector.extract_strided_slice %187 {offsets = [0, 0], sizes = [1, 256], strides = [1, 1]} : vector<2x256xbf16> to vector<1x256xbf16>
    %c0_47 = arith.constant 0 : index
    %c0_48 = arith.constant 0 : index
    %c0_49 = arith.constant 0 : index
    %189 = vector.load %arg9[%c0_47, %c0_48, %c0_49] : memref<2x256x128xbf16, #tpu.memory_space<vmem>>, vector<1x256x128xbf16>
    %190 = vector.shape_cast %189 : vector<1x256x128xbf16> to vector<256x128xbf16>
    %cst_50 = arith.constant dense<0.000000e+00> : vector<1x128xf32>
    %191 = tpu.matmul %188, %190, %cst_50 {dimension_numbers = #tpu.dot_dimension_numbers<[1], [0], [0], [1], [0, 0, 1, 1], [], []>} : vector<1x256xbf16>, vector<256x128xbf16>, vector<1x128xf32> -> vector<1x128xf32>
    %192 = arith.addf %186, %191 : vector<1x128xf32>
    %193 = vector.extract_strided_slice %187 {offsets = [1, 0], sizes = [1, 256], strides = [1, 1]} : vector<2x256xbf16> to vector<1x256xbf16>
    %c1_51 = arith.constant 1 : index
    %c0_52 = arith.constant 0 : index
    %c0_53 = arith.constant 0 : index
    %194 = vector.load %arg9[%c1_51, %c0_52, %c0_53] : memref<2x256x128xbf16, #tpu.memory_space<vmem>>, vector<1x256x128xbf16>
    %195 = vector.shape_cast %194 : vector<1x256x128xbf16> to vector<256x128xbf16>
    %cst_54 = arith.constant dense<0.000000e+00> : vector<1x128xf32>
    %196 = tpu.matmul %193, %195, %cst_54 {dimension_numbers = #tpu.dot_dimension_numbers<[1], [0], [0], [1], [0, 0, 1, 1], [], []>} : vector<1x256xbf16>, vector<256x128xbf16>, vector<1x128xf32> -> vector<1x128xf32>
    %197 = arith.addf %192, %196 : vector<1x128xf32>
    %198 = tpu.concatenate %181, %197 in 0 : vector<1x128xf32>, vector<1x128xf32> -> vector<2x128xf32>
    %c0_55 = arith.constant 0 : index
    %c0_56 = arith.constant 0 : index
    %199 = vector.load %arg11[%c0_55, %c0_56] : memref<1x128xf32, #tpu.memory_space<vmem>>, vector<1x128xf32>
    %200 = vector.broadcast %199 : vector<1x128xf32> to vector<2x128xf32>
    %201 = arith.addf %198, %200 : vector<2x128xf32>
    %cst_57 = arith.constant 0.000000e+00 : f32
    %202 = vector.broadcast %cst_57 : f32 to vector<2x128xf32>
    %203 = arith.maximumf %201, %202 : vector<2x128xf32>
    %204 = arith.truncf %203 : vector<2x128xf32> to vector<2x128xbf16>
    %c0_58 = arith.constant 0 : index
    %c0_59 = arith.constant 0 : index
    %205 = vector.load %arg12[%c0_58, %c0_59] : memref<128x18xbf16, #tpu.memory_space<vmem>>, vector<128x18xbf16>
    %cst_60 = arith.constant dense<0.000000e+00> : vector<2x18xf32>
    %206 = tpu.matmul %204, %205, %cst_60 {dimension_numbers = #tpu.dot_dimension_numbers<[1], [0], [0], [1], [0, 0, 1, 1], [], []>} : vector<2x128xbf16>, vector<128x18xbf16>, vector<2x18xf32> -> vector<2x18xf32>
    %c0_61 = arith.constant 0 : index
    %c0_62 = arith.constant 0 : index
    %207 = vector.load %arg13[%c0_61, %c0_62] : memref<1x18xf32, #tpu.memory_space<vmem>>, vector<1x18xf32>
    %208 = vector.broadcast %207 : vector<1x18xf32> to vector<2x18xf32>
    %209 = arith.addf %206, %208 : vector<2x18xf32>
    %210 = vector.extract_strided_slice %209 {offsets = [0, 15], sizes = [2, 3], strides = [1, 1]} : vector<2x18xf32> to vector<2x3xf32>
    %cst_63 = arith.constant dense<0xFF800000> : vector<2xf32>
    %211 = vector.multi_reduction <maximumf>, %210, %cst_63 [1] : vector<2x3xf32> to vector<2xf32>
    %212 = vector.shape_cast %211 : vector<2xf32> to vector<2x1xf32>
    %213 = vector.broadcast %212 : vector<2x1xf32> to vector<2x3xf32>
    %214 = arith.subf %210, %213 : vector<2x3xf32>
    %215 = math.exp %214 : vector<2x3xf32>
    %cst_64 = arith.constant dense<0.000000e+00> : vector<2xf32>
    %216 = vector.multi_reduction <add>, %215, %cst_64 [1] : vector<2x3xf32> to vector<2xf32>
    %217 = vector.shape_cast %216 : vector<2xf32> to vector<2x1xf32>
    %218 = tpu.reciprocal %217 {approx = true} : vector<2x1xf32> -> vector<2x1xf32>
    %219 = vector.broadcast %218 : vector<2x1xf32> to vector<2x3xf32>
    %220 = arith.mulf %215, %219 : vector<2x3xf32>
    %cst_65 = arith.constant 0.000000e+00 : f32
    %221 = vector.broadcast %cst_65 : f32 to vector<2x5xf32>
    %222 = vector.extract_strided_slice %209 {offsets = [0, 0], sizes = [2, 5], strides = [1, 1]} : vector<2x18xf32> to vector<2x5xf32>
    %223 = vector.extract_strided_slice %220 {offsets = [0, 0], sizes = [2, 1], strides = [1, 1]} : vector<2x3xf32> to vector<2x1xf32>
    %224 = vector.broadcast %223 : vector<2x1xf32> to vector<2x5xf32>
    %225 = arith.mulf %222, %224 : vector<2x5xf32>
    %226 = arith.addf %221, %225 : vector<2x5xf32>
    %227 = vector.extract_strided_slice %209 {offsets = [0, 5], sizes = [2, 5], strides = [1, 1]} : vector<2x18xf32> to vector<2x5xf32>
    %228 = vector.extract_strided_slice %220 {offsets = [0, 1], sizes = [2, 1], strides = [1, 1]} : vector<2x3xf32> to vector<2x1xf32>
    %229 = vector.broadcast %228 : vector<2x1xf32> to vector<2x5xf32>
    %230 = arith.mulf %227, %229 : vector<2x5xf32>
    %231 = arith.addf %226, %230 : vector<2x5xf32>
    %232 = vector.extract_strided_slice %209 {offsets = [0, 10], sizes = [2, 5], strides = [1, 1]} : vector<2x18xf32> to vector<2x5xf32>
    %233 = vector.extract_strided_slice %220 {offsets = [0, 2], sizes = [2, 1], strides = [1, 1]} : vector<2x3xf32> to vector<2x1xf32>
    %234 = vector.broadcast %233 : vector<2x1xf32> to vector<2x5xf32>
    %235 = arith.mulf %232, %234 : vector<2x5xf32>
    %236 = arith.addf %231, %235 : vector<2x5xf32>
    %c0_66 = arith.constant 0 : index
    %c0_67 = arith.constant 0 : index
    %237 = vector.load %arg14[%c0_66, %c0_67] : memref<2x5xf32, #tpu.memory_space<vmem>>, vector<2x5xf32>
    tpu.vector_store %arg14[%c0_66, %c0_67], %236 {strides = array<i32>} : memref<2x5xf32, #tpu.memory_space<vmem>>, vector<2x5xf32>,
    return
  }
  func.func @transform_0(%arg0: i32) -> (i32, i32, i32) {
    %c0_i32 = arith.constant 0 : i32
    %c0_i32_0 = arith.constant 0 : i32
    %c0_i32_1 = arith.constant 0 : i32
    return %arg0, %c0_i32, %c0_i32_0 : i32, i32, i32
  }
  func.func @transform_1(%arg0: i32) -> (i32, i32, i32) {
    %c0_i32 = arith.constant 0 : i32
    %c0_i32_0 = arith.constant 0 : i32
    %c0_i32_1 = arith.constant 0 : i32
    return %arg0, %c0_i32, %c0_i32_0 : i32, i32, i32
  }
  func.func @transform_2(%arg0: i32) -> (i32, i32) {
    %c0_i32 = arith.constant 0 : i32
    %c0_i32_0 = arith.constant 0 : i32
    %c0_i32_1 = arith.constant 0 : i32
    return %c0_i32, %c0_i32_0 : i32, i32
  }
  func.func @transform_3(%arg0: i32) -> (i32, i32) {
    %c0_i32 = arith.constant 0 : i32
    %c0_i32_0 = arith.constant 0 : i32
    %c0_i32_1 = arith.constant 0 : i32
    return %c0_i32, %c0_i32_0 : i32, i32
  }
  func.func @transform_4(%arg0: i32) -> (i32, i32) {
    %c0_i32 = arith.constant 0 : i32
    %c0_i32_0 = arith.constant 0 : i32
    %c0_i32_1 = arith.constant 0 : i32
    return %c0_i32, %c0_i32_0 : i32, i32
  }
  func.func @transform_5(%arg0: i32) -> (i32, i32) {
    %c0_i32 = arith.constant 0 : i32
    %c0_i32_0 = arith.constant 0 : i32
    %c0_i32_1 = arith.constant 0 : i32
    return %c0_i32, %c0_i32_0 : i32, i32
  }
  func.func @transform_6(%arg0: i32) -> (i32, i32) {
    %c0_i32 = arith.constant 0 : i32
    %c0_i32_0 = arith.constant 0 : i32
    %c0_i32_1 = arith.constant 0 : i32
    return %c0_i32, %c0_i32_0 : i32, i32
  }
  func.func @transform_7(%arg0: i32) -> (i32, i32) {
    %c0_i32 = arith.constant 0 : i32
    %c0_i32_0 = arith.constant 0 : i32
    %c0_i32_1 = arith.constant 0 : i32
    return %c0_i32, %c0_i32_0 : i32, i32
  }
  func.func @transform_8(%arg0: i32) -> (i32, i32, i32) {
    %c0_i32 = arith.constant 0 : i32
    %c0_i32_0 = arith.constant 0 : i32
    %c0_i32_1 = arith.constant 0 : i32
    %c0_i32_2 = arith.constant 0 : i32
    return %c0_i32, %c0_i32_0, %c0_i32_1 : i32, i32, i32
  }
  func.func @transform_9(%arg0: i32) -> (i32, i32) {
    %c0_i32 = arith.constant 0 : i32
    %c0_i32_0 = arith.constant 0 : i32
    %c0_i32_1 = arith.constant 0 : i32
    return %c0_i32, %c0_i32_0 : i32, i32
  }
  func.func @transform_10(%arg0: i32) -> (i32, i32) {
    %c0_i32 = arith.constant 0 : i32
    %c0_i32_0 = arith.constant 0 : i32
    %c0_i32_1 = arith.constant 0 : i32
    return %c0_i32, %c0_i32_0 : i32, i32
  }
  func.func @transform_11(%arg0: i32) -> (i32, i32) {
    %c0_i32 = arith.constant 0 : i32
    %c0_i32_0 = arith.constant 0 : i32
    %c0_i32_1 = arith.constant 0 : i32
    return %c0_i32, %c0_i32_0 : i32, i32
  }
  func.func @transform_12(%arg0: i32) -> (i32, i32) {
    %c0_i32 = arith.constant 0 : i32
    %c0_i32_0 = arith.constant 0 : i32
    %c0_i32_1 = arith.constant 0 : i32
    return %c0_i32, %c0_i32_0 : i32, i32
  }
  func.func @transform_13(%arg0: i32) -> (i32, i32) {
    %c0_i32 = arith.constant 0 : i32
    %c0_i32_0 = arith.constant 0 : i32
    return %arg0, %c0_i32 : i32, i32
  }
}

</mosaic_0001>

<bundles_post_ra>
// kernel: tpu_custom_call.1
= control target key start
LH: loop header
LB: loop body
LE: loop exit
PB: predicated region body
PF: predicated region fallthrough
CT: control target
= control target key end

     0   :  { %18 = vsyncpa [#allocation3], 0  ;;  %s3096_s0 = inlined_call_operand.vmem [shape: f32[2,16,6], index: 0, kind: input, shape index: {}]   ;;  %s3097_s1 = inlined_call_operand.hbm [shape: f32[2,1,96], index: 1, kind: input, shape index: {}]   ;;  %s3098_s2 = inlined_call_operand.hbm [shape: bf16[6,192], index: 2, kind: input, shape index: {}]   ;;  %s3099_s3 = inlined_call_operand.vmem [shape: f32[1,64], index: 3, kind: input, shape index: {}]   ;;  %s3100_s4 = inlined_call_operand.vmem [shape: bf16[64,384], index: 4, kind: input, shape index: {}]   ;;  %s3101_s5 = inlined_call_operand.hbm [shape: f32[1,128], index: 5, kind: input, shape index: {}]   ;;  %s3102_s6 = inlined_call_operand.hbm [shape: bf16[128,768], index: 6, kind: input, shape index: {}]   ;;  %s3103_s7 = inlined_call_operand.hbm [shape: f32[1,256], index: 7, kind: input, shape index: {}]   ;;  %s3104_s8 = inlined_call_operand.hbm [shape: bf16[2,256,128], index: 8, kind: input, shape index: {}]   ;;  %s3105_s9 = inlined_call_operand.vmem [shape: bf16[96,128], index: 9, kind: input, shape index: {}]   ;;  %s3106_s10 = inlined_call_operand.hbm [shape: f32[1,128], index: 10, kind: input, shape index: {}]   ;;  %s3107_s11 = inlined_call_operand.vmem [shape: bf16[128,18], index: 11, kind: input, shape index: {}]   ;;  %s3108_s12 = inlined_call_operand.vmem [shape: f32[1,18], index: 12, kind: input, shape index: {}]   ;;  %s3109_s13 = inlined_call_operand.hbm [shape: f32[2,5], index: 13, kind: output, shape index: {}]  }
   0x1   :  { %19 = vsyncpa [#allocation6], 0 }
   0x2   :  { %20 = vsyncpa [#allocation9], 0 }
   0x3   :  { %21 = vsyncpa [#allocation12], 0 }
   0x4   :  { %22 = vsyncpa [#allocation4], 0  ;;  %s2645_s25 = smov [#allocation5]   ;;  %s2646_s27 = smov [#allocation8]  }
   0x5   :  { %s43_s26 = sshll.u32 %s2645_s25, 4  ;;  %s66_s28 = sshll.u32 %s2646_s27, 4  ;;  %s44_s26 = int_to_ptr.vmem [resolvable:$true] %s43_s26  ;;  %s2739_s28 = int_to_ptr.vmem [resolvable:$true] %s66_s28 }
   0x6   :  { %s2459_s14 = scalar_lea.hbm %s3098_s2, 128 }
   0x7   :  { %p2460_p0 = scmp.ne.s32.totalorder %s3098_s2, %s2459_s14  ;;  %p2463_p1 = scmp.lt.u32.totalorder %s2459_s14, %s3098_s2 }
   0x9   :  { %p2465_p2 = pnand %p2463_p1, %p2460_p0 }
   0xb   :  { %2468 = shalt.err (!%p2465_p2)
}
   0xc   :  { %s2469_s19 = scalar_lea.vmem %s44_s26, 128  ;;  %p2474_p4 = scmp.lt.s32.totalorder %s44_s26, %s44_s26 }
   0xd   :  { %p2470_p3 = scmp.ne.s32.totalorder %s44_s26, %s2469_s19  ;;  %p2475_p5 = scmp.lt.s32.totalorder %s2469_s19, %s2469_s19 }
   0xf   :  { %p2476_p6 = por %p2475_p5, %p2474_p4 }
  0x11   :  { %p2477_p7 = pnand %p2476_p6, %p2470_p3 }
  0x13   :  { %2480 = shalt.err (!%p2477_p7)
}
  0x14   :  { %46 = dma.hbm_to_vmem [thread:$0]  %s3098_s2, 128, %s44_s26, [#allocation6]  }
  0x15   :  { %s2481_s24 = scalar_lea.hbm %s3102_s6, 6144 }
  0x16   :  { %p2482_p8 = scmp.ne.s32.totalorder %s3102_s6, %s2481_s24  ;;  %p2485_p9 = scmp.lt.u32.totalorder %s2481_s24, %s3102_s6 }
  0x18   :  { %p2487_p10 = pnand %p2485_p9, %p2482_p8 }
  0x1a   :  { %2490 = shalt.err (!%p2487_p10)
}
  0x1b   :  { %s2491_s14 = scalar_lea.vmem %s2739_s28, 6144  ;;  %p2496_p12 = scmp.lt.s32.totalorder %s2739_s28, %s2739_s28 }
  0x1c   :  { %p2492_p11 = scmp.ne.s32.totalorder %s2739_s28, %s2491_s14  ;;  %p2497_p13 = scmp.lt.s32.totalorder %s2491_s14, %s2491_s14 }
  0x1e   :  { %p2498_p0 = por %p2497_p13, %p2496_p12 }
  0x20   :  { %p2499_p1 = pnand %p2498_p0, %p2492_p11 }
  0x22   :  { %2502 = shalt.err (!%p2499_p1)
}
  0x23   :  { %s2647_s2 = smov 384   ;;  %s2648_s26 = smov 24  }
  0x24   :  { %72 = dma.hbm_to_vmem [thread:$0]  %s3102_s6, 6144, %s2739_s28, [#allocation9], %s2647_s2, %s2647_s2, %s2648_s26  }
  0x25   :  { %s2649_s17 = smov [#allocation11]   ;;  %s2503_s21 = scalar_lea.hbm %s3104_s8, 4096 }
  0x26   :  { %s88_s18 = sshll.u32 %s2649_s17, 4  ;;  %p2504_p2 = scmp.ne.s32.totalorder %s3104_s8, %s2503_s21  ;;  %s89_s18 = int_to_ptr.vmem [resolvable:$true] %s88_s18 }
  0x27   :  { %p2507_p3 = scmp.lt.u32.totalorder %s2503_s21, %s3104_s8 }
  0x29   :  { %p2509_p4 = pnand %p2507_p3, %p2504_p2 }
  0x2b   :  { %2512 = shalt.err (!%p2509_p4)
}
  0x2c   :  { %s2513_s27 = scalar_lea.vmem %s89_s18, 4096  ;;  %p2518_p6 = scmp.lt.s32.totalorder %s89_s18, %s89_s18 }
  0x2d   :  { %p2514_p5 = scmp.ne.s32.totalorder %s89_s18, %s2513_s27  ;;  %p2519_p7 = scmp.lt.s32.totalorder %s2513_s27, %s2513_s27 }
  0x2f   :  { %p2520_p8 = por %p2519_p7, %p2518_p6 }
  0x31   :  { %p2521_p9 = pnand %p2520_p8, %p2514_p5 }
  0x33   :  { %2524 = shalt.err (!%p2521_p9)
}
  0x34   :  { %s2650_s6 = smov 64   ;;  %s2651_s28 = smov 4  }
  0x35   :  { %94 = dma.hbm_to_vmem [thread:$0]  %s3104_s8, 4096, %s89_s18, [#allocation12], %s2650_s6, %s2650_s6, %s2651_s28  }
  0x36   :  { %s2652_s14 = smov [#allocation2]   ;;  %s2525_s16 = scalar_lea.hbm %s3097_s1, 32 }
  0x37   :  { %s30_s2 = sshll.u32 %s2652_s14, 4  ;;  %p2526_p10 = scmp.ne.s32.totalorder %s3097_s1, %s2525_s16  ;;  %s31_s2 = int_to_ptr.vmem [resolvable:$true] %s30_s2 }
  0x38   :  { %p2529_p11 = scmp.lt.u32.totalorder %s2525_s16, %s3097_s1 }
  0x3a   :  { %p2531_p12 = pnand %p2529_p11, %p2526_p10 }
  0x3c   :  { %2534 = shalt.err (!%p2531_p12)
}
  0x3d   :  { %s2535_s22 = scalar_lea.vmem %s31_s2, 32  ;;  %p2540_p0 = scmp.lt.s32.totalorder %s31_s2, %s31_s2 }
  0x3e   :  { %p2536_p13 = scmp.ne.s32.totalorder %s31_s2, %s2535_s22  ;;  %p2541_p1 = scmp.lt.s32.totalorder %s2535_s22, %s2535_s22 }
  0x40   :  { %p2542_p2 = por %p2541_p1, %p2540_p0 }
  0x42   :  { %p2543_p3 = pnand %p2542_p2, %p2536_p13 }
  0x44   :  { %2546 = shalt.err (!%p2543_p3)
}
  0x45   :  { %s2653_s8 = smov 16   ;;  %s2654_s18 = smov 1  }
  0x46   :  { %36 = dma.hbm_to_vmem [thread:$0]  %s3097_s1, 32, %s31_s2, [#allocation3], %s2653_s8, %s2653_s8, %s2654_s18  }
  0x47   :  { %s2655_s25 = smov [#allocation7]   ;;  %s2656_s28 = smov [#allocation10]  }
  0x48   :  { %s57_s27 = sshll.u32 %s2655_s25, 4  ;;  %s79_s29 = sshll.u32 %s2656_s28, 4  ;;  %s58_s27 = int_to_ptr.vmem [resolvable:$true] %s57_s27  ;;  %s80_s29 = int_to_ptr.vmem [resolvable:$true] %s79_s29 }
  0x49   :  { %s2547_s26 = scalar_lea.hbm %s3101_s5, 16 }
  0x4a   :  { %p2548_p4 = scmp.ne.s32.totalorder %s3101_s5, %s2547_s26  ;;  %p2551_p5 = scmp.lt.u32.totalorder %s2547_s26, %s3101_s5 }
  0x4c   :  { %p2553_p6 = pnand %p2551_p5, %p2548_p4 }
  0x4e   :  { %2556 = shalt.err (!%p2553_p6)
}
  0x4f   :  { %s2557_s1 = scalar_lea.vmem %s58_s27, 16  ;;  %s2561_s2 = scalar_lea.vmem %s58_s27, 32 }
  0x50   :  { %p2558_p7 = scmp.ne.s32.totalorder %s58_s27, %s2557_s1  ;;  %p2562_p8 = scmp.lt.s32.totalorder %s58_s27, %s58_s27 }
  0x51   :  { %p2563_p9 = scmp.lt.s32.totalorder %s2561_s2, %s2557_s1 }
  0x53   :  { %p2564_p10 = por %p2563_p9, %p2562_p8 }
  0x55   :  { %p2565_p11 = pnand %p2564_p10, %p2558_p7 }
  0x57   :  { %2568 = shalt.err (!%p2565_p11)
}
  0x58   :  { %60 = dma.hbm_to_vmem [thread:$0]  %s3101_s5, 16, %s58_s27, [#allocation6]  }
  0x59   :  { %s2569_s18 = scalar_lea.hbm %s3103_s7, 32 }
  0x5a   :  { %p2570_p12 = scmp.ne.s32.totalorder %s3103_s7, %s2569_s18  ;;  %p2573_p13 = scmp.lt.u32.totalorder %s2569_s18, %s3103_s7 }
  0x5c   :  { %p2575_p0 = pnand %p2573_p13, %p2570_p12 }
  0x5e   :  { %2578 = shalt.err (!%p2575_p0)
}
  0x5f   :  { %s2579_s30 = scalar_lea.vmem %s80_s29, 32  ;;  %p2584_p2 = scmp.lt.s32.totalorder %s80_s29, %s80_s29 }
  0x60   :  { %p2580_p1 = scmp.ne.s32.totalorder %s80_s29, %s2579_s30  ;;  %p2585_p3 = scmp.lt.s32.totalorder %s2579_s30, %s2579_s30 }
  0x62   :  { %p2586_p4 = por %p2585_p3, %p2584_p2 }
  0x64   :  { %p2587_p5 = pnand %p2586_p4, %p2580_p1 }
  0x66   :  { %2590 = shalt.err (!%p2587_p5)
}
  0x67   :  { %82 = dma.hbm_to_vmem [thread:$0]  %s3103_s7, 32, %s80_s29, [#allocation9]  }
  0x68   :  { %s2657_s14 = smov [#allocation13]   ;;  %s2591_s17 = scalar_lea.hbm %s3106_s10, 16 }
  0x69   :  { %s103_s26 = sshll.u32 %s2657_s14, 4  ;;  %p2592_p6 = scmp.ne.s32.totalorder %s3106_s10, %s2591_s17  ;;  %s104_s26 = int_to_ptr.vmem [resolvable:$true] %s103_s26 }
  0x6a   :  { %p2595_p7 = scmp.lt.u32.totalorder %s2591_s17, %s3106_s10 }
  0x6c   :  { %p2597_p8 = pnand %p2595_p7, %p2592_p6 }
  0x6e   :  { %2600 = shalt.err (!%p2597_p8)
}
  0x6f   :  { %s2601_s21 = scalar_lea.vmem %s104_s26, 16  ;;  %s2605_s7 = scalar_lea.vmem %s104_s26, 32 }
  0x70   :  { %p2602_p9 = scmp.ne.s32.totalorder %s104_s26, %s2601_s21  ;;  %p2606_p10 = scmp.lt.s32.totalorder %s104_s26, %s104_s26 }
  0x71   :  { %p2607_p11 = scmp.lt.s32.totalorder %s2605_s7, %s2601_s21 }
  0x73   :  { %p2608_p12 = por %p2607_p11, %p2606_p10 }
  0x75   :  { %p2609_p13 = pnand %p2608_p12, %p2602_p9 }
  0x77   :  { %2612 = shalt.err (!%p2609_p13)
}
  0x78   :  { %106 = dma.hbm_to_vmem [thread:$0]  %s3106_s10, 16, %s104_s26, [#allocation12]  }
  0x79   :  { %2635 = dma.done.wait [#allocation3], 32  }
  0x7a   :  { %2636 = vsyncadd [#allocation3], 4294967264 }
  0x7b   :  { %2637 = dma.done.wait [#allocation6], 144  }
  0x7c   :  { %2638 = vsyncadd [#allocation6], 4294967152 }
  0x7d   :  { %2639 = dma.done.wait [#allocation9], 6176  }
  0x7e   :  { %2640 = vsyncadd [#allocation9], 4294961120 }
  0x7f   :  { %2641 = dma.done.wait [#allocation12], 4112  }
  0x80   :  { %2642 = vsyncadd [#allocation12], 4294963184  ;;  %v2658_v0 = vmov 0   ;;  %vm149_vm0 = vcmask 1042432   ;;  %v165_v1 = vld [vmem:[#allocation5] sm:$0x77] }
  0x81   :  { %219 = vmatprep.mubr.bf16.mxu0 %v2658_v0  ;;  %239 = vmatprep.mubr.bf16.mxu1 %v2658_v0  ;;  %v133_v2 = vld [vmem:[%s3096_s0] sm:$0xff]  ;;  %v134_v3 = vld [vmem:[%s3096_s0 + $0x8] sm:$0xff]  ;;  %vm140_vm1 = vcmask 1040384   ;;  %vm171_vm2 = vcmask 48128   ;;  %v1979_v4 = vcombine.high %v165_v1, %v165_v1  ;;  %v1978_v5 = vcombine.low %v165_v1, %v165_v1  ;;  %v1976_v8 = vld [vmem:[%s3096_s0 + $0x10] sm:$0xff]  ;;  %s2667_s5 = smov 118  }
  0x82   :  { %v141_v6 = vrot.slane %v133_v2, 7  ;;  %v142_v7 = vrot.slane %v134_v3, 7  ;;  %v1977_v9 = vld [vmem:[%s3096_s0 + $0x18] sm:$0xff]  ;;  %vm158_vm3 = vcmask 1041408   ;;  %v150_v16 = vrot.slane %v1976_v8, 5  ;;  %s2668_s27 = smov [#allocation14]  }
  0x83   :  { %v151_v10 = vrot.slane %v1977_v9, 5  ;;  %1980 = vmatprep.subr.msk.bf16.mxu0 %vm149_vm0, %v1979_v4  ;;  %v182_v11 = vsel %vm149_vm0, %v1978_v5, 0  ;;  %2290 = vmatprep.subr.msk.bf16.mxu1 %vm149_vm0, %v1979_v4  ;;  %vm252_vm4 = vcmask 1046528   ;;  %vm269_vm5 = vcmask 1045504   ;;  %v2323_v47 = vld [vmem:[%s3100_s4 + $0x4] ss:$12 sps:$4 sm:$0xff]  }
  0x84   :  { %v143_v12 = vsel %vm140_vm1, %v141_v6, %v142_v7  ;;  %v156_v13 = vsel %vm140_vm1, 0.0, %v141_v6  ;;  %v157_v14 = vsel %vm140_vm1, %v142_v7, 0.0  ;;  %188 = vmatpush1.bf16.msra.mxu0 %v182_v11  ;;  %2291 = vmatpush1.bf16.msra.mxu1 %v182_v11  ;;  %v2321_v50 = vld [vmem:[%s3100_s4] ss:$12 sps:$4 sm:$0xff]   ;;  %v2324_v51 = vld [vmem:[%s3100_s4 + $0x8] ss:$12 sps:$4 sm:$0xff]  }
  0x85   :  { %v162_v15 = vpack.c.bf16 %v143_v12, %v156_v13  ;;  %v161_v17 = vsel %vm149_vm0, %v151_v10, 0.0  ;;  %v159_v18 = vsel %vm158_vm3, %v157_v14, 0.0  ;;  %v152_v20 = vsel %vm149_vm0, %v150_v16, %v151_v10  ;;  %494 = vmatprep.subr.bf16.mxu1 %v2323_v47  ;;  %2226 = vmatprep.subr.bf16.mxu0 %v2324_v51  ;;  %v2327_v56 = vld [vmem:[%s3100_s4 + $0x1c] ss:$12 sps:$4 sm:$0xff]   ;;  %v2325_v57 = vld [vmem:[%s3100_s4 + $0x18] ss:$12 sps:$4 sm:$0xff]  }
  0x86   :  { %v164_v19 = vpack.c.bf16 %v161_v17, %v161_v17  ;;  %v160_v21 = vsel %vm149_vm0, %v159_v18, %v150_v16  ;;  %v2328_v58 = vld [vmem:[%s3100_s4 + $0x20] ss:$12 sps:$4 sm:$0xff]   ;;  %v2329_v60 = vld [vmem:[%s3100_s4 + $0x30] ss:$12 sps:$4 sm:$0xff]   ;;  %v2332_v61 = vld [vmem:[%s3100_s4 + $0x38] ss:$12 sps:$4 sm:$0xff]  }
  0x87   :  { %1981 = vmatmul.mubr.msk.bf16.vlgmr.msra.gmra.mrb[0].mxu0 %vm171_vm2, %v162_v15  ;;  %v163_v22 = vpack.c.bf16 %v152_v20, %v160_v21  ;;  %v2331_v59 = vld [vmem:[%s3100_s4 + $0x34] ss:$12 sps:$4 sm:$0xff]   ;;  %v2335_v62 = vld [vmem:[%s3100_s4 + $0x4c] ss:$12 sps:$4 sm:$0xff]   ;;  %v2336_v1 = vld [vmem:[%s3100_s4 + $0x50] ss:$12 sps:$4 sm:$0xff]  }
  0x88   :  { %1983 = vmatmul.mubr.msk.bf16.vlgmr.msra.gmra.mrb[0].mxu1 %vm171_vm2, %v164_v19  ;;  %229 = vmatprep.mubr.bf16.mxu0 %v2658_v0  ;;  %v2333_v63 = vld [vmem:[%s3100_s4 + $0x48] ss:$12 sps:$4 sm:$0xff]   ;;  %v1984_v4 = vld [vmem:[%s3099_s3] ss:$0 sm:$0xff]  ;;  %vm316_vm6 = vcmask 1043456   ;;  %vm318_vm7 = vcmask 1044480  }
  0x89   :  { %526 = vmatprep.mubr.bf16.mxu1 %v2658_v0  ;;  %495 = vmatpush1.bf16.msra.mxu1 %v2321_v50  ;;  %vm487_vm8 = vcmask 523264   ;;  %vm2659_vm9 = vmmov 1   ;;  %vm2661_vm11 = vmmov 0   ;;  %vm1428_vm12 = vcmask 785408   ;;  %s2662_s4 = smov 113   ;;  %s1964_s14 = sshll.u32 %s2668_s27, 4  ;;  %s1965_s14 = int_to_ptr.vmem [resolvable:$true] %s1964_s14 }
  0x8a   :  { %2227 = vmatpush3.bf16.msra.mxu0 %v2324_v51  ;;  %496 = vmatprep.subr.bf16.mxu1 %v2327_v56  ;;  %vm2969_vm10 = vmpackc.low %vm149_vm0, %vm2659_vm9  ;;  %vm1912_vm13 = vcmask 140408   ;;  %vm1923_vm14 = vcmask 17408   ;;  %vm1956_vm15 = vcmask 33792   ;;  %s2613_s26 = scalar_lea.vmem %s1965_s14, 32  ;;  %p2618_p1 = scmp.lt.s32.totalorder %s1965_s14, %s1965_s14 }
  0x8b   :  { %2228 = vmatprep.subr.bf16.mxu0 %v2328_v58  ;;  %p2614_p0 = scmp.ne.s32.totalorder %s1965_s14, %s2613_s26  ;;  %p2619_p2 = scmp.lt.s32.totalorder %s2613_s26, %s2613_s26 }
  0x8d   :  { %497 = vmatpush1.bf16.msra.mxu1 %v2325_v57  ;;  %p2620_p3 = por %p2619_p2, %p2618_p1 }
  0x8e   :  { %2229 = vmatpush3.bf16.msra.mxu0 %v2328_v58  ;;  %498 = vmatprep.subr.bf16.mxu1 %v2331_v59 }
  0x8f   :  { %1982 = vmatmul.mubr.msk.bf16.gmra.mrb[4].mxu0 %vm171_vm2, %v163_v22  ;;  %2230 = vmatprep.subr.bf16.mxu0 %v2332_v61  ;;  %p2621_p4 = pnand %p2620_p3, %p2614_p0 }
  0x91   :  { %499 = vmatpush1.bf16.msra.mxu1 %v2329_v60 }
  0x92   :  { %2231 = vmatpush3.bf16.msra.mxu0 %v2332_v61  ;;  %500 = vmatprep.subr.bf16.mxu1 %v2335_v62 }
  0x93   :  { %2232 = vmatprep.subr.bf16.mxu0 %v2336_v1 }
  0x95   :  { %501 = vmatpush1.bf16.msra.mxu1 %v2333_v63 }
  0x96   :  { %2233 = vmatpush3.bf16.msra.mxu0 %v2336_v1 }
 0x15a   :  { %v2861_v23 = vpop.f32.mrb[0].mxu0 }
 0x15b   :  { %v2863_v24 = vpop.f32.mrb[0].mxu1  ;;  %v223_v25 = vpop.f32.mrb[1].mxu0  ;;  %v253_v29 = vrot.slane %v2861_v23, 1 }
 0x15c   :  { %v2865_v26 = vpop.f32.mrb[1].mxu1  ;;  %v2867_v27 = vpop.f32.mrb[2].mxu0  ;;  %v270_v33 = vrot.slane %v223_v25, 2  ;;  %v326_v40 = vrot.slane %v2863_v24, 1 }
 0x15d   :  { %v245_v28 = vpop.f32.mrb[2].mxu1  ;;  %v254_v30 = vrot.slane %v2867_v27, 1  ;;  %v227_v31 = vpop.f32.mrb[3].mxu0  ;;  %v344_v43 = vrot.slane %v2865_v26, 2 }
 0x15e   :  { %v246_v32 = vpop.f32.mrb[3].mxu1  ;;  %v271_v34 = vrot.slane %v227_v31, 2 }
 0x15f   :  { %v255_v35 = vsel %vm252_vm4, %v253_v29, %v254_v30 }
 0x160   :  { %258 = vrot.lane.b32.xlu0 %v255_v35, %s2650_s6  ;;  %v272_v36 = vsel %vm269_vm5, %v270_v33, %v271_v34 }
 0x162   :  { %v231_v37 = vpop.f32.mrb[4].mxu0 }
 0x163   :  { %v256_v38 = vrot.slane %v231_v37, 1  ;;  %v233_v39 = vpop.f32.mrb[5].mxu0 }
 0x164   :  { %v273_v41 = vrot.slane %v233_v39, 2  ;;  %v235_v42 = vpop.f32.mrb[6].mxu0 }
 0x165   :  { %v324_v44 = vrot.slane %v235_v42, 1  ;;  %v237_v45 = vpop.f32.mrb[7].mxu0  ;;  %v257_v46 = vsel %vm252_vm4, %v254_v30, %v256_v38 }
 0x166   :  { %v342_v48 = vrot.slane %v237_v45, 2  ;;  %260 = vrot.lane.b32.xlu1 %v257_v46, %s2650_s6  ;;  %v274_v49 = vsel %vm269_vm5, %v271_v34, %v273_v41 }
 0x167   :  { %v325_v52 = vsel %vm252_vm4, %v256_v38, %v324_v44  ;;  %v327_v53 = vsel %vm252_vm4, %v324_v44, %v326_v40 }
 0x168   :  { %328 = vrot.lane.b32.xlu0 %v325_v52, %s2650_s6  ;;  %v343_v54 = vsel %vm269_vm5, %v273_v41, %v342_v48  ;;  %v345_v55 = vsel %vm269_vm5, %v342_v48, %v344_v43 }
 0x16a   :  { %330 = vrot.lane.b32.xlu1 %v327_v53, %s2650_s6 }
 0x16c   :  { %332 = vrot.lane.b32.xlu0 %v326_v40, %s2650_s6 }
 0x1d2   :  { %v259_v2 = vpop.permute.xlu0 %258 }
 0x1d3   :  { %v264_v3 = vadd.f32 %v259_v2, %v2861_v23 }
 0x1d5   :  { %v277_v5 = vadd.f32 %v272_v36, %v264_v3 }
 0x1d7   :  { %v285_v6 = vadd.f32 %v1984_v4, %v277_v5 }
 0x1d8   :  { %v261_v7 = vpop.permute.xlu1 %260 }
 0x1d9   :  { %v287_v8 = vmax.f32 %v285_v6, 0.0  ;;  %v265_v9 = vadd.f32 %v261_v7, %v2867_v27 }
 0x1da   :  { %v329_v10 = vpop.permute.xlu0 %328 }
 0x1db   :  { %v290_v11 = vrot.slane %v287_v8, 1  ;;  %v278_v12 = vadd.f32 %v274_v49, %v265_v9  ;;  %v337_v13 = vadd.f32 %v329_v10, %v231_v37 }
 0x1dc   :  { %v331_v14 = vpop.permute.xlu1 %330 }
 0x1dd   :  { %v292_v15 = vmax.f32 %v287_v8, %v290_v11  ;;  %v286_v16 = vadd.f32 %v1984_v4, %v278_v12  ;;  %v349_v17 = vadd.f32 %v343_v54, %v337_v13  ;;  %v338_v18 = vadd.f32 %v331_v14, %v235_v42  ;;  %v2339_v12 = vld [vmem:[#allocation8 + $0x4] ss:$24 sps:$4 sm:$0xff]   ;;  %v2337_v13 = vld [vmem:[#allocation8] ss:$24 sps:$4 sm:$0xff]  }
 0x1de   :  { %v333_v19 = vpop.permute.xlu0 %332  ;;  %v2342_v14 = vld [vmem:[#allocation8 + $0xc] ss:$24 sps:$4 sm:$0xff]   ;;  %969 = vmatprep.subr.bf16.mxu1 %v2339_v12 }
 0x1df   :  { %v298_v20 = vrot.slane %v292_v15, 1  ;;  %v300_v21 = vrot.slane %v292_v15, 2  ;;  %v288_v22 = vmax.f32 %v286_v16, 0.0  ;;  %v352_v23 = vadd.f32 %v1984_v4, %v349_v17  ;;  %1012 = vmatprep.subr.bf16.mxu0 %v2342_v14  ;;  %v2345_v16 = vld [vmem:[#allocation8 + $0x34] ss:$24 sps:$4 sm:$0xff]  }
 0x1e0   :  { %v350_v25 = vadd.f32 %v345_v55, %v338_v18  ;;  %v339_v28 = vadd.f32 %v333_v19, %v2863_v24  ;;  %v302_v35 = vrot.slane %v292_v15, 3  ;;  %v2343_v17 = vld [vmem:[#allocation8 + $0x30] ss:$24 sps:$4 sm:$0xff]   ;;  %v2348_v18 = vld [vmem:[#allocation8 + $0x3c] ss:$24 sps:$4 sm:$0xff]  }
 0x1e1   :  { %v313_v29 = vsel %vm140_vm1, %v292_v15, %v298_v20  ;;  %v294_v27 = vrot.slane %v288_v22, 1  ;;  %v355_v30 = vmax.f32 %v352_v23, 0.0  ;;  %v2340_v15 = vld [vmem:[#allocation8 + $0x8] ss:$24 sps:$4 sm:$0xff]   ;;  %v2346_v19 = vld [vmem:[#allocation8 + $0x38] ss:$24 sps:$4 sm:$0xff]  }
 0x1e2   :  { %v353_v31 = vadd.f32 %v1984_v4, %v350_v25  ;;  %v351_v32 = vadd.f32 %v344_v43, %v339_v28  ;;  %v314_v33 = vsel %vm158_vm3, %v313_v29, %v300_v21  ;;  %v2351_v20 = vld [vmem:[#allocation8 + $0x64] ss:$24 sps:$4 sm:$0xff]   ;;  %v2349_v21 = vld [vmem:[#allocation8 + $0x60] ss:$24 sps:$4 sm:$0xff]   ;;  %v2357_v25 = vld [vmem:[#allocation8 + $0x94] ss:$24 sps:$4 sm:$0xff]  }
 0x1e3   :  { %v296_v34 = vmax.f32 %v288_v22, %v294_v27  ;;  %v359_v36 = vrot.slane %v355_v30, 1  ;;  %v315_v24 = vsel %vm149_vm0, %v314_v33, %v302_v35  ;;  %v2354_v22 = vld [vmem:[#allocation8 + $0x6c] ss:$24 sps:$4 sm:$0xff]   ;;  %v2352_v23 = vld [vmem:[#allocation8 + $0x68] ss:$24 sps:$4 sm:$0xff]  }
 0x1e4   :  { %v356_v37 = vmax.f32 %v353_v31, 0.0  ;;  %v354_v38 = vadd.f32 %v1984_v4, %v351_v32  ;;  %v2355_v28 = vld [vmem:[#allocation8 + $0x90] ss:$24 sps:$4 sm:$0xff]   ;;  %v2360_v29 = vld [vmem:[#allocation8 + $0x9c] ss:$24 sps:$4 sm:$0xff]  }
 0x1e5   :  { %v305_v39 = vrot.slane %v296_v34, 4  ;;  %v307_v40 = vrot.slane %v296_v34, 5  ;;  %v361_v41 = vmax.f32 %v355_v30, %v359_v36  ;;  %v309_v48 = vrot.slane %v296_v34, 6  ;;  %v2358_v27 = vld [vmem:[#allocation8 + $0x98] ss:$24 sps:$4 sm:$0xff]  }
 0x1e6   :  { %v363_v42 = vrot.slane %v356_v37, 1  ;;  %v357_v44 = vmax.f32 %v354_v38, 0.0  ;;  %v311_v51 = vrot.slane %v296_v34, 7  ;;  %v2363_v30 = vld [vmem:[#allocation8 + $0xc4] ss:$24 sps:$4 sm:$0xff]  }
 0x1e7   :  { %v317_v45 = vsel %vm316_vm6, %v315_v24, %v305_v39  ;;  %v371_v26 = vrot.slane %v361_v41, 2  ;;  %v373_v43 = vrot.slane %v361_v41, 3  ;;  %v375_v46 = vrot.slane %v361_v41, 4  ;;  %v2361_v31 = vld [vmem:[#allocation8 + $0xc0] ss:$24 sps:$4 sm:$0xff]  }
 0x1e8   :  { %v365_v47 = vmax.f32 %v356_v37, %v363_v42  ;;  %v367_v49 = vrot.slane %v357_v44, 1  ;;  %v319_v50 = vsel %vm318_vm7, %v317_v45, %v307_v40  ;;  %v2366_v32 = vld [vmem:[#allocation8 + $0xcc] ss:$24 sps:$4 sm:$0xff]   ;;  %v2364_v33 = vld [vmem:[#allocation8 + $0xc8] ss:$24 sps:$4 sm:$0xff]  }
 0x1e9   :  { %v387_v52 = vsel %vm140_vm1, %v371_v26, %v373_v43  ;;  %v320_v57 = vsel %vm269_vm5, %v319_v50, %v309_v48  ;;  %v2369_v34 = vld [vmem:[#allocation8 + $0xf4] ss:$24 sps:$4 sm:$0xff]   ;;  %v2367_v35 = vld [vmem:[#allocation8 + $0xf0] ss:$24 sps:$4 sm:$0xff]   ;;  %v2375_v38 = vld [vmem:[#allocation8 + $0x124] ss:$24 sps:$4 sm:$0xff]  }
 0x1ea   :  { %v378_v53 = vrot.slane %v365_v47, 5  ;;  %v380_v54 = vrot.slane %v365_v47, 6  ;;  %v388_v55 = vsel %vm158_vm3, %v387_v52, %v375_v46  ;;  %v369_v56 = vmax.f32 %v357_v44, %v367_v49  ;;  %v2372_v36 = vld [vmem:[#allocation8 + $0xfc] ss:$24 sps:$4 sm:$0xff]   ;;  %v2370_v37 = vld [vmem:[#allocation8 + $0xf8] ss:$24 sps:$4 sm:$0xff]  }
 0x1eb   :  { %v382_v58 = vrot.slane %v365_v47, 7  ;;  %v321_v60 = vsel %vm252_vm4, %v320_v57, %v311_v51  ;;  %v2373_v39 = vld [vmem:[#allocation8 + $0x120] ss:$24 sps:$4 sm:$0xff]   ;;  %v2378_v40 = vld [vmem:[#allocation8 + $0x12c] ss:$24 sps:$4 sm:$0xff]  }
 0x1ec   :  { %v389_v59 = vsel %vm149_vm0, %v388_v55, %v378_v53  ;;  %v395_v62 = vrot.slane %v321_v60, 7  ;;  %v385_v63 = vrot.slane %v369_v56, 1  ;;  %v2376_v24 = vld [vmem:[#allocation8 + $0x128] ss:$24 sps:$4 sm:$0xff]   ;;  %v2381_v41 = vld [vmem:[#allocation8 + $0x154] ss:$24 sps:$4 sm:$0xff]  }
 0x1ed   :  { %v390_v61 = vsel %vm316_vm6, %v389_v59, %v380_v54  ;;  %v2379_v42 = vld [vmem:[#allocation8 + $0x150] ss:$24 sps:$4 sm:$0xff]   ;;  %v2384_v44 = vld [vmem:[#allocation8 + $0x15c] ss:$24 sps:$4 sm:$0xff]  }
 0x1ee   :  { %v391_v1 = vsel %vm318_vm7, %v390_v61, %v382_v58  ;;  %v401_v3 = vsel %vm140_vm1, %v395_v62, 0.0  ;;  %v400_v8 = vsel %vm140_vm1, 0.0, %v395_v62  ;;  %v2382_v45 = vld [vmem:[#allocation8 + $0x158] ss:$24 sps:$4 sm:$0xff]   ;;  %v2387_v26 = vld [vmem:[#allocation8 + $0x14] ss:$24 sps:$4 sm:$0xff]  }
 0x1ef   :  { %v392_v2 = vsel %vm269_vm5, %v391_v1, %v365_v47  ;;  %v402_v6 = vsel %vm158_vm3, %v401_v3, 0.0  ;;  %v2001_v62 = vld [vmem:[#allocation7] ss:$0 sm:$0xff] }
 0x1f0   :  { %v393_v4 = vsel %vm252_vm4, %v392_v2, %v385_v63 }
 0x1f1   :  { %v398_v5 = vrot.slane %v393_v4, 5 }
 0x1f3   :  { %v404_v7 = vsel %vm149_vm0, %v398_v5, 0.0  ;;  %v403_v9 = vsel %vm149_vm0, %v402_v6, %v398_v5 }
 0x1f4   :  { %v406_v10 = vpack.c.bf16 %v404_v7, %v404_v7  ;;  %v405_v11 = vpack.c.bf16 %v403_v9, %v400_v8 }
 0x1f6   :  { %1997 = vmatmul.mubr.msk.bf16.vlgmr.msra.gmra.mrb[4].mxu1 %vm487_vm8, %v405_v11  ;;  %2234 = vmatprep.mubr.msk.bf16.mxu0 %vm487_vm8, %v405_v11 }
 0x1f7   :  { %2235 = vmatmul.mubr.msk.bf16.vlgmr.msra.gmra.mrb[8].mxu0 %vm487_vm8, %v406_v10  ;;  %536 = vmatprep.mubr.bf16.mxu1 %v2658_v0 }
 0x1f8   :  { %1044 = vmatprep.mubr.bf16.mxu0 %v2658_v0  ;;  %970 = vmatpush1.bf16.msra.mxu1 %v2337_v13 }
 0x1f9   :  { %1013 = vmatpush1.bf16.msra.mxu0 %v2340_v15  ;;  %971 = vmatprep.subr.bf16.mxu1 %v2345_v16 }
 0x1fa   :  { %1014 = vmatprep.subr.bf16.mxu0 %v2348_v18 }
 0x1fc   :  { %972 = vmatpush1.bf16.msra.mxu1 %v2343_v17 }
 0x1fd   :  { %1015 = vmatpush1.bf16.msra.mxu0 %v2346_v19  ;;  %973 = vmatprep.subr.bf16.mxu1 %v2351_v20 }
 0x1fe   :  { %1998 = vmatmul.mubr.msk.bf16.gmra.mrb[8].mxu1 %vm487_vm8, %v406_v10  ;;  %1016 = vmatprep.subr.bf16.mxu0 %v2354_v22 }
 0x1ff   :  { %1001 = vmatprep.mubr.bf16.mxu1 %v2658_v0 }
 0x200   :  { %974 = vmatpush1.bf16.msra.mxu1 %v2349_v21 }
 0x201   :  { %1017 = vmatpush1.bf16.msra.mxu0 %v2352_v23  ;;  %975 = vmatprep.subr.bf16.mxu1 %v2357_v25 }
 0x202   :  { %1018 = vmatprep.subr.bf16.mxu0 %v2360_v29 }
 0x204   :  { %976 = vmatpush1.bf16.msra.mxu1 %v2355_v28 }
 0x205   :  { %1019 = vmatpush1.bf16.msra.mxu0 %v2358_v27  ;;  %977 = vmatprep.subr.bf16.mxu1 %v2363_v30 }
 0x206   :  { %1020 = vmatprep.subr.bf16.mxu0 %v2366_v32 }
 0x208   :  { %978 = vmatpush1.bf16.msra.mxu1 %v2361_v31 }
 0x209   :  { %1021 = vmatpush1.bf16.msra.mxu0 %v2364_v33  ;;  %979 = vmatprep.subr.bf16.mxu1 %v2369_v34 }
 0x20a   :  { %1022 = vmatprep.subr.bf16.mxu0 %v2372_v36 }
 0x20c   :  { %980 = vmatpush1.bf16.msra.mxu1 %v2367_v35 }
 0x20d   :  { %1023 = vmatpush1.bf16.msra.mxu0 %v2370_v37  ;;  %981 = vmatprep.subr.bf16.mxu1 %v2375_v38 }
 0x20e   :  { %1024 = vmatprep.subr.bf16.mxu0 %v2378_v40 }
 0x210   :  { %982 = vmatpush1.bf16.msra.mxu1 %v2373_v39 }
 0x211   :  { %1025 = vmatpush1.bf16.msra.mxu0 %v2376_v24  ;;  %983 = vmatprep.subr.bf16.mxu1 %v2381_v41 }
 0x212   :  { %1026 = vmatprep.subr.bf16.mxu0 %v2384_v44  ;;  %v2385_v44 = vld [vmem:[#allocation8 + $0x10] ss:$24 sps:$4 sm:$0xff]  }
 0x214   :  { %984 = vmatpush1.bf16.msra.mxu1 %v2379_v42 }
 0x215   :  { %1027 = vmatpush1.bf16.msra.mxu0 %v2382_v45  ;;  %1055 = vmatprep.subr.bf16.mxu1 %v2387_v26 }
 0x2c9   :  { %v528_v43 = vpop.f32.mrb[4].mxu1 }
 0x2ca   :  { %v530_v46 = vpop.f32.mrb[5].mxu1  ;;  %v2236_v47 = vpop.f32.mrb[8].mxu0 }
 0x2cb   :  { %v532_v48 = vpop.f32.mrb[6].mxu1  ;;  %v579_v49 = vpop.f32.mrb[9].mxu0  ;;  %v596_v52 = vrot.slane %v530_v46, 1  ;;  %v638_v55 = vrot.slane %v2236_v47, 2  ;;  %v2388_v46 = vld [vmem:[#allocation8 + $0x40] ss:$24 sps:$4 sm:$0xff]  }
 0x2cc   :  { %v534_v50 = vpop.f32.mrb[7].mxu1  ;;  %v2237_v51 = vpop.f32.mrb[10].mxu0  ;;  %v603_v56 = vrot.slane %v579_v49, 2  ;;  %v2393_v47 = vld [vmem:[#allocation8 + $0x74] ss:$24 sps:$4 sm:$0xff]  }
 0x2cd   :  { %v597_v53 = vrot.slane %v534_v50, 1  ;;  %v582_v54 = vpop.f32.mrb[11].mxu0  ;;  %v2396_v49 = vld [vmem:[#allocation8 + $0xa4] ss:$24 sps:$4 sm:$0xff]   ;;  %v2394_v50 = vld [vmem:[#allocation8 + $0xa0] ss:$24 sps:$4 sm:$0xff]  }
 0x2ce   :  { %v604_v57 = vrot.slane %v582_v54, 2  ;;  %v2399_v51 = vld [vmem:[#allocation8 + $0xd4] ss:$24 sps:$4 sm:$0xff]   ;;  %v2400_v54 = vld [vmem:[#allocation8 + $0x100] ss:$24 sps:$4 sm:$0xff]  }
 0x2cf   :  { %v598_v58 = vsel %vm252_vm4, %v596_v52, %v597_v53  ;;  %v2397_v52 = vld [vmem:[#allocation8 + $0xd0] ss:$24 sps:$4 sm:$0xff]  }
 0x2d0   :  { %v600_v59 = vadd.f32 %v598_v58, %v528_v43  ;;  %v605_v60 = vsel %vm269_vm5, %v603_v56, %v604_v57  ;;  %v639_v61 = vsel %vm269_vm5, %v604_v57, %v638_v55  ;;  %v2390_v43 = vld [vmem:[#allocation8 + $0x44] ss:$24 sps:$4 sm:$0xff]   ;;  %v2406_v57 = vld [vmem:[#allocation8 + $0x160] ss:$24 sps:$4 sm:$0xff]  }
 0x2d1   :  { %v538_v63 = vpop.f32.mrb[8].mxu1  ;;  %v2408_v56 = vld [vmem:[#allocation8 + $0x164] ss:$24 sps:$4 sm:$0xff]   ;;  %v2981_v58 = vld [vmem:[%s3105_s9] sm:$0xff]  }
 0x2d2   :  { %v607_v1 = vadd.f32 %v605_v60, %v600_v59  ;;  %v540_v2 = vpop.f32.mrb[9].mxu1  ;;  %v2660_v59 = vmov 0.0   ;;  %v2991_v60 = vld [vmem:[%s3105_s9 + $0x8] sm:$0xff]  }
 0x2d3   :  { %v631_v3 = vrot.slane %v540_v2, 1  ;;  %v542_v4 = vpop.f32.mrb[10].mxu1  ;;  %v2417_v2 = vld [vmem:[#allocation11 + $0x48] sm:$0xff]  }
 0x2d4   :  { %v614_v5 = vadd.f32 %v2001_v62, %v607_v1  ;;  %v543_v6 = vpop.f32.mrb[11].mxu1  ;;  %v2416_v1 = vld [vmem:[#allocation11] sm:$0xff]   ;;  %v2418_v4 = vld [vmem:[#allocation11 + $0x8] sm:$0xff]  }
 0x2d5   :  { %v632_v7 = vsel %vm252_vm4, %v597_v53, %v631_v3  ;;  %v636_v8 = vadd.f32 %v631_v3, %v538_v63  ;;  %v2402_v53 = vld [vmem:[#allocation8 + $0x104] ss:$24 sps:$4 sm:$0xff]   ;;  %v3013_v3 = vld [vmem:[%s3105_s9 + $0x20] sm:$0xff]  }
 0x2d6   :  { %v615_v9 = vmax.f32 %v614_v5, 0.0  ;;  %v635_v10 = vadd.f32 %v632_v7, %v532_v48  ;;  %v2391_v48 = vld [vmem:[#allocation8 + $0x70] ss:$24 sps:$4 sm:$0xff]   ;;  %v3020_v6 = vld [vmem:[%s3105_s9 + $0x28] sm:$0xff]   ;;  %v1208_v7 = vld [vmem:[#allocation2] sm:$0x1] }
 0x2d7   :  { %v643_v11 = vadd.f32 %v638_v55, %v636_v8  ;;  %v2405_v55 = vld [vmem:[#allocation8 + $0x134] ss:$24 sps:$4 sm:$0xff]   ;;  %v2415_v63 = vld [vmem:[#allocation11 + $0x40] sm:$0xff]  }
 0x2d8   :  { %v617_v12 = vrot.slane %v615_v9, 1  ;;  %v642_v13 = vadd.f32 %v639_v61, %v635_v10  ;;  %v2998_v61 = vld [vmem:[%s3105_s9 + $0x10] sm:$0xff]   ;;  %2115 = vmatprep.subr.bf16.mxu0 %v2415_v63  ;;  %v2419_v5 = vld [vmem:[#allocation11 + $0x50] sm:$0xff]   ;;  %v1209_v10 = vpack.c.bf16 %v1208_v7, %v1208_v7 }
 0x2d9   :  { %v645_v14 = vadd.f32 %v2001_v62, %v643_v11  ;;  %v2420_v8 = vld [vmem:[#allocation11 + $0x10] sm:$0xff]   ;;  %v2422_v11 = vld [vmem:[#allocation11 + $0x18] sm:$0xff]  }
 0x2da   :  { %v619_v15 = vmax.f32 %v615_v9, %v617_v12  ;;  %v644_v16 = vadd.f32 %v2001_v62, %v642_v13  ;;  %v3004_v62 = vld [vmem:[%s3105_s9 + $0x18] sm:$0xff]   ;;  %v2421_v9 = vld [vmem:[#allocation11 + $0x58] sm:$0xff]   ;;  %v2423_v12 = vld [vmem:[#allocation11 + $0x60] sm:$0xff]  }
 0x2db   :  { %v647_v17 = vmax.f32 %v645_v14, 0.0  ;;  %v2424_v13 = vld [vmem:[#allocation11 + $0x20] sm:$0xff]   ;;  %v2425_v14 = vld [vmem:[#allocation11 + $0x68] sm:$0xff]  }
 0x2dc   :  { %v621_v18 = vrot.slane %v619_v15, 1  ;;  %v623_v19 = vrot.slane %v619_v15, 2  ;;  %v646_v20 = vmax.f32 %v644_v16, 0.0  ;;  %v625_v22 = vrot.slane %v619_v15, 3  ;;  %v2427_v16 = vld [vmem:[#allocation11 + $0x70] sm:$0xff]  }
 0x2dd   :  { %v653_v21 = vrot.slane %v647_v17, 1 }
 0x2de   :  { %v627_v23 = vsel %vm140_vm1, %v619_v15, %v621_v18  ;;  %v649_v25 = vrot.slane %v646_v20, 1  ;;  %v2426_v15 = vld [vmem:[#allocation11 + $0x28] sm:$0xff]   ;;  %v2429_v18 = vld [vmem:[#allocation11 + $0x78] sm:$0xff]  }
 0x2df   :  { %v628_v28 = vsel %vm158_vm3, %v627_v23, %v623_v19  ;;  %v655_v30 = vmax.f32 %v647_v17, %v653_v21  ;;  %v2428_v17 = vld [vmem:[#allocation11 + $0x30] sm:$0xff]   ;;  %v2430_v19 = vld [vmem:[#allocation11 + $0x38] sm:$0xff]  }
 0x2e0   :  { %v629_v29 = vsel %vm149_vm0, %v628_v28, %v625_v22  ;;  %v651_v27 = vmax.f32 %v646_v20, %v649_v25  ;;  %v2431_v20 = vld [vmem:[#allocation11 + $0xc0] sm:$0xff]  }
 0x2e1   :  { %v670_v31 = vrot.slane %v629_v29, 7  ;;  %v664_v36 = vrot.slane %v655_v30, 5 }
 0x2e2   :  { %v657_v32 = vrot.slane %v651_v27, 2  ;;  %v659_v33 = vrot.slane %v651_v27, 3  ;;  %v661_v34 = vrot.slane %v651_v27, 4 }
 0x2e3   :  { %v675_v35 = vsel %vm140_vm1, 0.0, %v670_v31 }
 0x2e4   :  { %v666_v37 = vsel %vm140_vm1, %v657_v32, %v659_v33  ;;  %v676_v39 = vsel %vm318_vm7, %v675_v35, 0.0 }
 0x2e5   :  { %v667_v38 = vsel %vm158_vm3, %v666_v37, %v661_v34  ;;  %v677_v41 = vsel %vm269_vm5, %v676_v39, 0.0 }
 0x2e6   :  { %v668_v40 = vsel %vm149_vm0, %v667_v38, %v664_v36 }
 0x2e7   :  { %v673_v24 = vrot.slane %v668_v40, 1 }
 0x2e9   :  { %v678_v42 = vsel %vm252_vm4, %v677_v41, %v673_v24 }
 0x2ea   :  { %v2051_v26 = vpack.c.bf16 %v673_v24, %v678_v42  ;;  %v1116_v42 = vlaneseq }
 0x2ec   :  { %2052 = vmatmul.mubr.msk.bf16.vlgmr.msra.gmra.mrb[12].mxu1 %vm2969_vm10, %v2051_v26  ;;  %2055 = vmatmul.mubr.msk.bf16.vlgmr.msra.gmra.mrb[12].mxu0 %vm2969_vm10, %v2051_v26 }
 0x2ed   :  { %1056 = vmatpush1.bf16.msra.mxu1 %v2385_v44  ;;  %1087 = vmatprep.mubr.bf16.mxu1 %v2658_v0  ;;  %v2403_v0 = vld [vmem:[#allocation8 + $0x130] ss:$24 sps:$4 sm:$0xff]   ;;  %v1117_v44 = vshrl.u32 %v1116_v42, 7 }
 0x2ee   :  { %1057 = vmatprep.subr.bf16.mxu1 %v2390_v43  ;;  %2116 = vmatpush3.bf16.msra.mxu0 %v2416_v1 }
 0x2ef   :  { %2117 = vmatprep.subr.bf16.mxu0 %v2417_v2  ;;  %v1118_v45 = vsub.s32 0, %v1117_v44  ;;  %v1122_v43 = vsub.s32 1, %v1117_v44  ;;  %v2433_v44 = vld [vmem:[#allocation11 + $0xc8] sm:$0xff]  }
 0x2f1   :  { %1058 = vmatpush1.bf16.msra.mxu1 %v2388_v46 }
 0x2f2   :  { %1059 = vmatprep.subr.bf16.mxu1 %v2393_v47  ;;  %2118 = vmatpush3.bf16.msra.mxu0 %v2418_v4 }
 0x2f3   :  { %2119 = vmatprep.subr.bf16.mxu0 %v2419_v5 }
 0x2f5   :  { %1060 = vmatpush1.bf16.msra.mxu1 %v2391_v48 }
 0x2f6   :  { %1061 = vmatprep.subr.bf16.mxu1 %v2396_v49  ;;  %2120 = vmatpush3.bf16.msra.mxu0 %v2420_v8 }
 0x2f7   :  { %2121 = vmatprep.subr.bf16.mxu0 %v2421_v9 }
 0x2f9   :  { %1062 = vmatpush1.bf16.msra.mxu1 %v2394_v50 }
 0x2fa   :  { %1063 = vmatprep.subr.bf16.mxu1 %v2399_v51  ;;  %2122 = vmatpush3.bf16.msra.mxu0 %v2422_v11 }
 0x2fb   :  { %2123 = vmatprep.subr.bf16.mxu0 %v2423_v12 }
 0x2fd   :  { %1064 = vmatpush1.bf16.msra.mxu1 %v2397_v52 }
 0x2fe   :  { %1065 = vmatprep.subr.bf16.mxu1 %v2402_v53  ;;  %2124 = vmatpush3.bf16.msra.mxu0 %v2424_v13 }
 0x2ff   :  { %2125 = vmatprep.subr.bf16.mxu0 %v2425_v14 }
 0x301   :  { %1066 = vmatpush1.bf16.msra.mxu1 %v2400_v54 }
 0x302   :  { %1067 = vmatprep.subr.bf16.mxu1 %v2405_v55  ;;  %2126 = vmatpush3.bf16.msra.mxu0 %v2426_v15 }
 0x303   :  { %2127 = vmatprep.subr.bf16.mxu0 %v2427_v16 }
 0x305   :  { %1068 = vmatpush1.bf16.msra.mxu1 %v2403_v0 }
 0x306   :  { %1069 = vmatprep.subr.bf16.mxu1 %v2408_v56  ;;  %2128 = vmatpush3.bf16.msra.mxu0 %v2428_v17 }
 0x307   :  { %2129 = vmatprep.subr.bf16.mxu0 %v2429_v18 }
 0x309   :  { %1070 = vmatpush1.bf16.msra.mxu1 %v2406_v57 }
 0x30a   :  { %2238 = vmatprep.subr.bf16.mxu1 %v2660_v59  ;;  %2130 = vmatpush3.bf16.msra.mxu0 %v2430_v19 }
 0x30b   :  { %2144 = vmatprep.subr.bf16.mxu0 %v2431_v20 }
 0x30c   :  { %2058 = vmatmul.mubr.msk.bf16.vlgmr.msra.gmra.mrb[16].mxu1 %vm2969_vm10, %v2051_v26  ;;  %v1098_v26 = vld [vmem:[#allocation10] sm:$0x3] }
 0x30d   :  { %2239 = vmatpush3.bf16.msra.mxu1 %v2981_v58  ;;  %2250 = vmatprep.mubr.msk.bf16.mxu1 %vm2661_vm11, %v2660_v59  ;;  %v1119_v48 = vrot.slane %v1098_v26, %v1118_v45  ;;  %v1123_v51 = vrot.slane %v1098_v26, %v1122_v43 }
 0x30e   :  { %2240 = vmatprep.subr.bf16.mxu1 %v2660_v59 }
 0x311   :  { %2241 = vmatpush3.bf16.msra.mxu1 %v2991_v60 }
 0x312   :  { %2242 = vmatprep.subr.bf16.mxu1 %v2660_v59 }
 0x315   :  { %2243 = vmatpush3.bf16.msra.mxu1 %v2998_v61 }
 0x316   :  { %2244 = vmatprep.subr.bf16.mxu1 %v2660_v59 }
 0x319   :  { %2245 = vmatpush3.bf16.msra.mxu1 %v3004_v62 }
 0x31a   :  { %2246 = vmatprep.subr.bf16.mxu1 %v2660_v59 }
 0x31d   :  { %2247 = vmatpush3.bf16.msra.mxu1 %v3013_v3 }
 0x31e   :  { %2248 = vmatprep.subr.bf16.mxu1 %v2660_v59 }
 0x321   :  { %2249 = vmatpush3.bf16.msra.mxu1 %v3020_v6 }
 0x322   :  { %2166 = vmatprep.subr.bf16.mxu1 %v2415_v63 }
 0x324   :  { %2251 = vmatmul.mubr.msk.bf16.vlgmr.msra.gmra.mrb[20].mxu1 %vm1428_vm12, %v1209_v10 }
 0x325   :  { %2167 = vmatpush3.bf16.msra.mxu1 %v2416_v1 }
 0x326   :  { %2168 = vmatprep.subr.bf16.mxu1 %v2417_v2 }
 0x329   :  { %2169 = vmatpush3.bf16.msra.mxu1 %v2418_v4 }
 0x32a   :  { %2170 = vmatprep.subr.bf16.mxu1 %v2419_v5 }
 0x32d   :  { %2171 = vmatpush3.bf16.msra.mxu1 %v2420_v8 }
 0x32e   :  { %2172 = vmatprep.subr.bf16.mxu1 %v2421_v9 }
 0x331   :  { %2173 = vmatpush3.bf16.msra.mxu1 %v2422_v11 }
 0x332   :  { %2174 = vmatprep.subr.bf16.mxu1 %v2423_v12 }
 0x335   :  { %2175 = vmatpush3.bf16.msra.mxu1 %v2424_v13 }
 0x336   :  { %2176 = vmatprep.subr.bf16.mxu1 %v2425_v14 }
 0x339   :  { %2177 = vmatpush3.bf16.msra.mxu1 %v2426_v15 }
 0x33a   :  { %2178 = vmatprep.subr.bf16.mxu1 %v2427_v16 }
 0x33d   :  { %2179 = vmatpush3.bf16.msra.mxu1 %v2428_v17 }
 0x33e   :  { %2180 = vmatprep.subr.bf16.mxu1 %v2429_v18 }
 0x341   :  { %2181 = vmatpush3.bf16.msra.mxu1 %v2430_v19 }
 0x342   :  { %2195 = vmatprep.subr.bf16.mxu1 %v2431_v20 }
 0x3bf   :  { %v1003_v21 = vpop.f32.mrb[12].mxu1  ;;  %v1046_v22 = vpop.f32.mrb[12].mxu0 }
 0x3c0   :  { %v1101_v23 = vrot.slane %v1046_v22, 1  ;;  %v1005_v25 = vpop.f32.mrb[13].mxu1  ;;  %v1048_v28 = vpop.f32.mrb[13].mxu0 }
 0x3c1   :  { %v1102_v29 = vrot.slane %v1048_v28, 1  ;;  %v1007_v27 = vpop.f32.mrb[14].mxu1  ;;  %v1050_v30 = vpop.f32.mrb[14].mxu0 }
 0x3c2   :  { %v1105_v31 = vadd.f32 %v1101_v23, %v1003_v21  ;;  %v1148_v32 = vrot.slane %v1050_v30, 1  ;;  %v1009_v33 = vpop.f32.mrb[15].mxu1  ;;  %v1052_v34 = vpop.f32.mrb[15].mxu0 }
 0x3c3   :  { %v1106_v35 = vadd.f32 %v1102_v29, %v1005_v25  ;;  %v1150_v36 = vrot.slane %v1052_v34, 1 }
 0x3c4   :  { %v1149_v37 = vsel %vm252_vm4, %v1101_v23, %v1148_v32  ;;  %v1158_v38 = vadd.f32 %v1148_v32, %v1007_v27 }
 0x3c5   :  { %v1151_v39 = vsel %vm252_vm4, %v1102_v29, %v1150_v36  ;;  %v1159_v40 = vadd.f32 %v1150_v36, %v1009_v33  ;;  %v1156_v24 = vadd.f32 %v1149_v37, %v1003_v21 }
 0x3c6   :  { %v1157_v41 = vadd.f32 %v1151_v39, %v1005_v25 }
 0x3df   :  { %v1089_v46 = vpop.f32.mrb[16].mxu1 }
 0x3e0   :  { %v1109_v47 = vrot.slane %v1089_v46, 2  ;;  %v1091_v49 = vpop.f32.mrb[17].mxu1 }
 0x3e1   :  { %v1110_v50 = vrot.slane %v1091_v49, 2  ;;  %v1093_v52 = vpop.f32.mrb[18].mxu1  ;;  %v2436_v49 = vld [vmem:[#allocation11 + $0x90] sm:$0xff]  }
 0x3e2   :  { %v1113_v53 = vadd.f32 %v1109_v47, %v1105_v31  ;;  %v1162_v54 = vrot.slane %v1093_v52, 2  ;;  %v1095_v55 = vpop.f32.mrb[19].mxu1  ;;  %v2434_v47 = vld [vmem:[#allocation11 + $0x88] sm:$0xff]   ;;  %v2439_v52 = vld [vmem:[#allocation11 + $0xe0] sm:$0xff]  }
 0x3e3   :  { %v1114_v0 = vadd.f32 %v1110_v50, %v1106_v35  ;;  %v1163_v56 = vrot.slane %v1095_v55, 2  ;;  %v2437_v50 = vld [vmem:[#allocation11 + $0xd8] sm:$0xff]   ;;  %v2442_v55 = vld [vmem:[#allocation11 + $0xa8] sm:$0xff]  }
 0x3e4   :  { %v1126_v57 = vadd.f32 %v1119_v48, %v1113_v53  ;;  %v1166_v63 = vadd.f32 %v1162_v54, %v1156_v24  ;;  %v1168_v1 = vadd.f32 %v1162_v54, %v1158_v38  ;;  %v2440_v53 = vld [vmem:[#allocation11 + $0xa0] sm:$0xff]   ;;  %v2441_v54 = vld [vmem:[#allocation11 + $0xe8] sm:$0xff]  }
 0x3e5   :  { %v1127_v2 = vadd.f32 %v1123_v51, %v1114_v0  ;;  %v1167_v4 = vadd.f32 %v1163_v56, %v1157_v41  ;;  %v1169_v5 = vadd.f32 %v1163_v56, %v1159_v40  ;;  %v2432_v40 = vld [vmem:[#allocation11 + $0x80] sm:$0xff]   ;;  %v2443_v0 = vld [vmem:[#allocation11 + $0xf0] sm:$0xff]  }
 0x3e6   :  { %v1128_v7 = vmax.f32 %v1126_v57, 0.0  ;;  %v1170_v8 = vadd.f32 %v1166_v63, %v1119_v48  ;;  %v1172_v9 = vadd.f32 %v1168_v1, %v1119_v48  ;;  %v2435_v48 = vld [vmem:[#allocation11 + $0xd0] sm:$0xff]   ;;  %v2445_v57 = vld [vmem:[#allocation11 + $0xf8] sm:$0xff]  }
 0x3e7   :  { %v1129_v10 = vmax.f32 %v1127_v2, 0.0  ;;  %v1171_v11 = vadd.f32 %v1167_v4, %v1123_v51  ;;  %v1173_v12 = vadd.f32 %v1169_v5, %v1123_v51  ;;  %v2438_v51 = vld [vmem:[#allocation11 + $0x98] sm:$0xff]   ;;  %v2444_v56 = vld [vmem:[#allocation11 + $0xb0] sm:$0xff]  }
 0x3e8   :  { %v1132_v13 = vrot.slane %v1128_v7, 1  ;;  %v1174_v14 = vmax.f32 %v1170_v8, 0.0  ;;  %v1176_v15 = vmax.f32 %v1172_v9, 0.0  ;;  %v2446_v63 = vld [vmem:[#allocation11 + $0xb8] sm:$0xff]   ;;  %v2450_v8 = vld [vmem:[%s3107_s11 + $0x18] sm:$0xff]  }
 0x3e9   :  { %v1133_v16 = vrot.slane %v1129_v10, 1  ;;  %v1175_v17 = vmax.f32 %v1171_v11, 0.0  ;;  %v1177_v18 = vmax.f32 %v1173_v12, 0.0  ;;  %v2451_v9 = vld [vmem:[%s3107_s11 + $0x20] sm:$0xff]   ;;  %v2453_v11 = vld [vmem:[%s3107_s11 + $0x30] sm:$0xff]   ;;  %v2454_v12 = vld [vmem:[%s3107_s11 + $0x38] sm:$0xff]  }
 0x3ea   :  { %v1136_v19 = vmax.f32 %v1128_v7, %v1132_v13  ;;  %v1180_v20 = vrot.slane %v1174_v14, 1  ;;  %v1188_v21 = vrot.slane %v1176_v15, 1 }
 0x3eb   :  { %v1137_v22 = vmax.f32 %v1129_v10, %v1133_v16  ;;  %v1181_v23 = vrot.slane %v1175_v17, 1  ;;  %v1189_v25 = vrot.slane %v1177_v18, 1  ;;  %v2452_v10 = vld [vmem:[%s3107_s11 + $0x28] sm:$0xff]  }
 0x3ec   :  { %v1140_v28 = vrot.slane %v1136_v19, 1  ;;  %v1184_v29 = vmax.f32 %v1174_v14, %v1180_v20  ;;  %v1192_v27 = vmax.f32 %v1176_v15, %v1188_v21 }
 0x3ed   :  { %v1185_v30 = vmax.f32 %v1175_v17, %v1181_v23  ;;  %v1193_v31 = vmax.f32 %v1177_v18, %v1189_v25  ;;  %v1141_v32 = vrot.slane %v1137_v22, 1 }
 0x3ee   :  { %v1196_v33 = vrot.slane %v1184_v29, 6  ;;  %v1202_v34 = vrot.slane %v1192_v27, 7  ;;  %v1144_v35 = vsel %vm140_vm1, %v1136_v19, %v1140_v28 }
 0x3ef   :  { %v1197_v36 = vrot.slane %v1185_v30, 6  ;;  %v1203_v37 = vrot.slane %v1193_v31, 7  ;;  %v1145_v38 = vsel %vm140_vm1, %v1137_v22, %v1141_v32  ;;  %v1222_v41 = vpack.c.bf16 %v1144_v35, %v1144_v35 }
 0x3f0   :  { %v1223_v39 = vpack.c.bf16 %v1145_v38, %v1145_v38  ;;  %v1206_v24 = vsel %vm140_vm1, %v1196_v33, %v1202_v34 }
 0x3f1   :  { %v1207_v42 = vsel %vm140_vm1, %v1197_v36, %v1203_v37  ;;  %v1653_v43 = vpack.c.bf16 %v1206_v24, %v1206_v24  ;;  %v1506_v1 = vshrl.u32 %v1222_v41, 16 }
 0x3f2   :  { %1384 = vmatprep.mubr.bf16.mxu0 %v1223_v39  ;;  %v1509_v45 = vshrl.u32 %v1223_v39, 16  ;;  %v1654_v26 = vpack.c.bf16 %v1207_v42, %v1207_v42  ;;  %v2099_v42 = vld [vmem:[#allocation13] ss:$0 sm:$0xff] }
 0x3f3   :  { %1385 = vmatmul.mubr.bf16.vlgmr.msra.gmra.mrb[16].mxu0 %v1222_v41  ;;  %v1739_v2 = vshrl.u32 %v1653_v43, 16 }
 0x3f4   :  { %2145 = vmatpush3.bf16.msra.mxu0 %v2432_v40  ;;  %1641 = vmatprep.mubr.bf16.mxu0 %v1509_v45  ;;  %v1742_v46 = vshrl.u32 %v1654_v26, 16 }
 0x3f5   :  { %1687 = vmatprep.mubr.bf16.mxu1 %v1654_v26  ;;  %2146 = vmatprep.subr.bf16.mxu0 %v2433_v44 }
 0x3f6   :  { %1688 = vmatmul.mubr.bf16.vlgmr.msra.gmra.mrb[24].mxu1 %v1653_v43 }
 0x3f7   :  { %2196 = vmatpush3.bf16.msra.mxu1 %v2432_v40  ;;  %1778 = vmatprep.mubr.bf16.mxu1 %v1742_v46  ;;  %v1466_v5 = vpop.f32.mrb[20].mxu1  ;;  %v2100_v46 = vld [vmem:[%s3108_s12] ss:$0 sm:$0xff]  ;;  %s2666_s12 = smov 123  }
 0x3f8   :  { %2147 = vmatpush3.bf16.msra.mxu0 %v2434_v47  ;;  %2197 = vmatprep.subr.bf16.mxu1 %v2433_v44 }
 0x3f9   :  { %2148 = vmatprep.subr.bf16.mxu0 %v2435_v48 }
 0x3fb   :  { %2198 = vmatpush3.bf16.msra.mxu1 %v2434_v47 }
 0x3fc   :  { %2149 = vmatpush3.bf16.msra.mxu0 %v2436_v49  ;;  %2199 = vmatprep.subr.bf16.mxu1 %v2435_v48 }
 0x3fd   :  { %2150 = vmatprep.subr.bf16.mxu0 %v2437_v50 }
 0x3ff   :  { %2200 = vmatpush3.bf16.msra.mxu1 %v2436_v49 }
 0x400   :  { %2151 = vmatpush3.bf16.msra.mxu0 %v2438_v51  ;;  %2201 = vmatprep.subr.bf16.mxu1 %v2437_v50 }
 0x401   :  { %2152 = vmatprep.subr.bf16.mxu0 %v2439_v52 }
 0x403   :  { %2202 = vmatpush3.bf16.msra.mxu1 %v2438_v51 }
 0x404   :  { %2153 = vmatpush3.bf16.msra.mxu0 %v2440_v53  ;;  %2203 = vmatprep.subr.bf16.mxu1 %v2439_v52 }
 0x405   :  { %2154 = vmatprep.subr.bf16.mxu0 %v2441_v54 }
 0x407   :  { %2204 = vmatpush3.bf16.msra.mxu1 %v2440_v53 }
 0x408   :  { %2155 = vmatpush3.bf16.msra.mxu0 %v2442_v55  ;;  %2205 = vmatprep.subr.bf16.mxu1 %v2441_v54 }
 0x409   :  { %2156 = vmatprep.subr.bf16.mxu0 %v2443_v0 }
 0x40b   :  { %2206 = vmatpush3.bf16.msra.mxu1 %v2442_v55 }
 0x40c   :  { %2157 = vmatpush3.bf16.msra.mxu0 %v2444_v56  ;;  %2207 = vmatprep.subr.bf16.mxu1 %v2443_v0 }
 0x40d   :  { %2158 = vmatprep.subr.bf16.mxu0 %v2445_v57 }
 0x40f   :  { %2208 = vmatpush3.bf16.msra.mxu1 %v2444_v56 }
 0x410   :  { %2159 = vmatpush3.bf16.msra.mxu0 %v2446_v63  ;;  %2209 = vmatprep.subr.bf16.mxu1 %v2445_v57 }
 0x411   :  { %2254 = vmatprep.subr.bf16.mxu0 %v2660_v59 }
 0x413   :  { %2210 = vmatpush3.bf16.msra.mxu1 %v2446_v63  ;;  %1642 = vmatmul.mubr.bf16.vlgmr.msra.gmra.mrb[20].mxu0 %v1506_v1  ;;  %v2663_v63 = vmov 17   ;;  %v2664_v1 = vmov 16  }
 0x414   :  { %2255 = vmatpush3.bf16.msra.mxu0 %v2981_v58  ;;  %2266 = vmatprep.mubr.msk.bf16.mxu0 %vm2661_vm11, %v2660_v59  ;;  %v1651_v58 = vld [vmem:[#allocation2 + $0x1] sm:$0x1] }
 0x415   :  { %2256 = vmatprep.subr.bf16.mxu0 %v2660_v59  ;;  %v1652_v4 = vpack.c.bf16 %v1651_v58, %v1651_v58  ;;  %2317 = vset.pattern.permute.xlu0 %v2663_v63 }
 0x416   :  { %1779 = vmatmul.mubr.bf16.vlgmr.msra.gmra.mrb[28].mxu1 %v1739_v2  ;;  %2316 = vset.pattern.permute.xlu1 %v2664_v1 }
 0x418   :  { %2257 = vmatpush3.bf16.msra.mxu0 %v2991_v60  ;;  %v2252_v60 = vpop.f32.mrb[21].mxu1 }
 0x419   :  { %2258 = vmatprep.subr.bf16.mxu0 %v2660_v59  ;;  %v1469_v7 = vpop.f32.mrb[22].mxu1 }
 0x41c   :  { %2259 = vmatpush3.bf16.msra.mxu0 %v2998_v61  ;;  %v2253_v61 = vpop.f32.mrb[23].mxu1 }
 0x41d   :  { %2260 = vmatprep.subr.bf16.mxu0 %v2660_v59 }
 0x420   :  { %2261 = vmatpush3.bf16.msra.mxu0 %v3004_v62  ;;  %v2447_v62 = vld [vmem:[%s3107_s11] sm:$0xff]  }
 0x421   :  { %2262 = vmatprep.subr.bf16.mxu0 %v2660_v59 }
 0x424   :  { %2263 = vmatpush3.bf16.msra.mxu0 %v3013_v3  ;;  %v2448_v3 = vld [vmem:[%s3107_s11 + $0x8] sm:$0xff]  }
 0x425   :  { %2264 = vmatprep.subr.bf16.mxu0 %v2660_v59 }
 0x428   :  { %2265 = vmatpush3.bf16.msra.mxu0 %v3020_v6  ;;  %v2449_v6 = vld [vmem:[%s3107_s11 + $0x10] sm:$0xff]  }
 0x429   :  { %2270 = vmatprep.subr.bf16.mxu0 %v2660_v59 }
 0x42b   :  { %2267 = vmatmul.mubr.msk.bf16.vlgmr.msra.gmra.mrb[24].mxu0 %vm1428_vm12, %v1652_v4 }
 0x42c   :  { %2286 = vmatprep.mubr.msk.bf16.mxu0 %vm2661_vm11, %v2660_v59  ;;  %2271 = vmatpush3.bf16.msra.mxu0 %v2447_v62 }
 0x42d   :  { %2272 = vmatprep.subr.bf16.mxu0 %v2660_v59 }
 0x430   :  { %2273 = vmatpush3.bf16.msra.mxu0 %v2448_v3 }
 0x431   :  { %2274 = vmatprep.subr.bf16.mxu0 %v2660_v59 }
 0x434   :  { %2275 = vmatpush3.bf16.msra.mxu0 %v2449_v6 }
 0x435   :  { %2276 = vmatprep.subr.bf16.mxu0 %v2660_v59 }
 0x438   :  { %2277 = vmatpush3.bf16.msra.mxu0 %v2450_v8 }
 0x439   :  { %2278 = vmatprep.subr.bf16.mxu0 %v2660_v59 }
 0x43c   :  { %2279 = vmatpush3.bf16.msra.mxu0 %v2451_v9 }
 0x43d   :  { %2280 = vmatprep.subr.bf16.mxu0 %v2660_v59 }
 0x440   :  { %2281 = vmatpush3.bf16.msra.mxu0 %v2452_v10 }
 0x441   :  { %2282 = vmatprep.subr.bf16.mxu0 %v2660_v59 }
 0x444   :  { %2283 = vmatpush3.bf16.msra.mxu0 %v2453_v11 }
 0x445   :  { %2284 = vmatprep.subr.bf16.mxu0 %v2660_v59 }
 0x448   :  { %2285 = vmatpush3.bf16.msra.mxu0 %v2454_v12 }
 0x4c6   :  { %v2131_v13 = vpop.f32.mrb[16].mxu0 }
 0x4c7   :  { %v2132_v14 = vpop.f32.mrb[17].mxu0 }
 0x4c8   :  { %v2133_v15 = vadd.f32 %v2132_v14, %v2131_v13  ;;  %v2134_v16 = vpop.f32.mrb[18].mxu0 }
 0x4c9   :  { %v2182_v17 = vpop.f32.mrb[24].mxu1  ;;  %v2135_v18 = vpop.f32.mrb[19].mxu0 }
 0x4ca   :  { %v1467_v19 = vadd.f32 %v2133_v15, %v1466_v5  ;;  %v2183_v20 = vpop.f32.mrb[25].mxu1  ;;  %v2665_v5 = vmov 15  }
 0x4cb   :  { %v2184_v21 = vadd.f32 %v2183_v20, %v2182_v17  ;;  %v2185_v22 = vpop.f32.mrb[26].mxu1 }
 0x4cc   :  { %v2186_v23 = vpop.f32.mrb[27].mxu1 }
 0x4e6   :  { %v2160_v25 = vpop.f32.mrb[20].mxu0 }
 0x4e7   :  { %v2161_v28 = vpop.f32.mrb[21].mxu0 }
 0x4e8   :  { %v2162_v29 = vadd.f32 %v2161_v28, %v2160_v25  ;;  %v2163_v27 = vpop.f32.mrb[22].mxu0 }
 0x4e9   :  { %v2211_v30 = vpop.f32.mrb[28].mxu1  ;;  %v2164_v31 = vpop.f32.mrb[23].mxu0 }
 0x4ea   :  { %v1649_v32 = vadd.f32 %v2162_v29, %v1467_v19  ;;  %v2212_v59 = vpop.f32.mrb[29].mxu1 }
 0x4eb   :  { %v2213_v33 = vadd.f32 %v2212_v59, %v2211_v30  ;;  %v2214_v34 = vpop.f32.mrb[30].mxu1 }
 0x4ec   :  { %v2215_v35 = vpop.f32.mrb[31].mxu1 }
 0x4fe   :  { %v1732_v36 = vpop.f32.mrb[24].mxu0 }
 0x4ff   :  { %v1733_v37 = vadd.f32 %v2184_v21, %v1732_v36  ;;  %v2268_v38 = vpop.f32.mrb[25].mxu0 }
 0x500   :  { %v1735_v39 = vpop.f32.mrb[26].mxu0 }
 0x501   :  { %v1786_v40 = vadd.f32 %v2213_v33, %v1733_v37  ;;  %v2269_v24 = vpop.f32.mrb[27].mxu0 }
 0x503   :  { %v1788_v41 = vrot.slane %v1786_v40, 7 }
 0x505   :  { %v1790_v44 = vsel %vm140_vm1, %v1649_v32, %v1788_v41 }
 0x506   :  { %v1798_v45 = vadd.f32 %v2099_v42, %v1790_v44 }
 0x508   :  { %v1799_v26 = vmax.f32 %v1798_v45, 0.0 }
 0x50a   :  { %v1800_v43 = vpack.c.bf16 %v1799_v26, %v1799_v26 }
 0x50c   :  { %2287 = vmatmul.mubr.bf16.vlgmr.msra.gmra.mrb[28].mxu0 %v1800_v43 }
 0x5df   :  { %v1906_v47 = vpop.f32.mrb[28].mxu0 }
 0x5e0   :  { %v1907_v48 = vadd.f32 %v2100_v46, %v1906_v47  ;;  %v2288_v49 = vpop.f32.mrb[29].mxu0 }
 0x5e1   :  { %v1909_v50 = vpop.f32.mrb[30].mxu0 }
 0x5e2   :  { %v2289_v51 = vpop.f32.mrb[31].mxu0  ;;  %v1913_v52 = vsel %vm1912_vm13, %v1907_v48, -inf }
 0x5e3   :  { %1914 = vmax.xlane.f32.xlu1 %v1913_v52 }
 0x670   :  { %v1915_v53 = vpop.xlane.xlu1 %1914 }
 0x671   :  { %v1916_v54 = vsub.f32 %v1907_v48, %v1915_v53 }
 0x673   :  { %v1917_v55 = vmul.f32 1.442695, %v1916_v54 }
 0x675   :  { %2455 = vpow2.f32 %v1917_v55 }
 0x67f   :  { %v2456_v0 = vpop.eup %2455 }
 0x680   :  { %1920 = vrot.lane.b32.xlu0 %v2456_v0, %s2662_s4 }
 0x6f2   :  { %v1921_v56 = vpop.permute.xlu0 %1920 }
 0x6f3   :  { %v1924_v57 = vsel %vm1923_vm14, %v1921_v56, 0.0 }
 0x6f4   :  { %1925 = vadd.xlane.f32.xlu0 %v1924_v57 }
 0x781   :  { %v1926_v2 = vpop.xlane.xlu0 %1925 }
 0x782   :  { %2457 = vrcp.f32 %v1926_v2 }
 0x78c   :  { %v2458_v58 = vpop.eup %2457 }
 0x78d   :  { %v1928_v4 = vmul.f32 %v2458_v58, %v2456_v0 }
 0x78f   :  { %1947 = vperm.xlu0 %2317, %v1928_v4   ;;  %1937 = vperm.xlu1 %2316, %v1928_v4  }
 0x793   :  { %2318 = vset.pattern.permute.xlu1 %v2665_v5 }
 0x794   :  { %1931 = vperm.xlu1 %2318, %v1928_v4  }
 0x80e   :  { %v1938_v60 = vpop.permute.xlu1 %1937  ;;  %v1948_v61 = vpop.permute.xlu0 %1947 }
 0x80f   :  { %v1940_v7 = vmul.f32 %v1938_v60, %v1907_v48  ;;  %v1950_v62 = vmul.f32 %v1948_v61, %v1907_v48 }
 0x811   :  { %1942 = vrot.lane.b32.xlu1 %v1940_v7, %s2666_s12 }
 0x813   :  { %v1932_v3 = vpop.permute.xlu1 %1931 }
 0x814   :  { %v1934_v8 = vmul.f32 %v1932_v3, %v1907_v48 }
 0x815   :  { %1952 = vrot.lane.b32.xlu1 %v1950_v62, %s2667_s5 }
 0x883   :  { %v1943_v6 = vpop.permute.xlu1 %1942 }
 0x884   :  { %v1945_v9 = vadd.f32 %v1943_v6, %v1934_v8 }
 0x887   :  { %v1953_v10 = vpop.permute.xlu1 %1952 }
 0x888   :  { %v1955_v11 = vadd.f32 %v1953_v10, %v1945_v9 }
 0x88a   :  { %1957 = vst.msk [vmem:[#allocation14] sm:$0x3] %vm1956_vm15, %v1955_v11 }
 0x88b   :  { %2624 = shalt.err (!%p2621_p4)
}
 0x88c   :  { %s2625_s17 = scalar_lea.hbm %s3109_s13, 32 }
 0x88d   :  { %p2626_p5 = scmp.ne.s32.totalorder %s3109_s13, %s2625_s17  ;;  %p2629_p6 = scmp.lt.u32.totalorder %s2625_s17, %s3109_s13 }
 0x88f   :  { %p2631_p7 = pnand %p2629_p6, %p2626_p5 }
 0x891   :  { %2634 = shalt.err (!%p2631_p7)
}
 0x892   :  { %1967 = dma.vmem_to_hbm [thread:$0]  %s1965_s14, 32, %s3109_s13, [#allocation4]  }
 0x893   :  { %2643 = dma.done.wait [#allocation4], 32  }
 0x894   :  { %2644 = vsyncadd [#allocation4], 4294967264 }
 0x895   :  { %1971 = vsyncpa [#allocation3], 1 }
 0x896   :  { %1972 = vsyncpa [#allocation6], 1 }
 0x897   :  { %1973 = vsyncpa [#allocation9], 1 }
 0x898   :  { %1974 = vsyncpa [#allocation12], 1 }
 0x899   :  { %1975 = vsyncpa [#allocation4], 1 }

</bundles_post_ra>
